<compile_context>
chip_gen: v5e
topology: v5e:2x2
jax: 0.10.0
libtpu: 0.0.40
codegen_flags: <defaults>
</compile_context>

<pallas_src>
import jax
import jax.numpy as jnp
from jax.experimental import pallas as pl
from jax.experimental.pallas import tpu as pltpu

LANE = 128
SUBLANE = 8


def _round_up(x, m):
    return ((x + m - 1) // m) * m


def _fold_weight_norm(v, g):
    # weight_norm(dim=0): w = g * v / ||v||, norm per output channel over (Cin, K).
    norm = jnp.sqrt(jnp.sum(v * v, axis=(1, 2), keepdims=True))
    return g * v / norm


# ------------------------- host-side parameter packing --------------------------

def pack_params(blocks, lin, input_dim):
    """Build kernel-ready packed parameters.

    Per block: one combined (K*Cmax, 2*Cmax) weight
      rows [t*Cmax, t*Cmax+cin) / cols [0, cout)        : conv tap t (weight_norm folded)
      rows [Cmax,  Cmax+cin)   / cols [Cmax, Cmax+cout) : 1x1 downsample OR identity
    plus a (1, 2*Cmax) combined bias.  out_proj: the PyTorch flatten(1) order
    (index = c*L + l) is folded into a (L, Cmax, OPAD) weight.
    """
    L = input_dim
    K = blocks[0]["v"].shape[2]
    Cmax = max(max(p["v"].shape[0], p["v"].shape[1]) for p in blocks)
    wpack, bpack = [], []
    for p in blocks:
        cout, cin, _ = p["v"].shape
        w = _fold_weight_norm(p["v"], p["g"])              # (cout, cin, K)
        wt = jnp.transpose(w, (2, 1, 0))                   # (K, cin, cout)
        wc = jnp.zeros((K * Cmax, 2 * Cmax), jnp.float32)
        for t in range(K):
            wc = wc.at[t * Cmax:t * Cmax + cin, :cout].set(wt[t])
        if p["wd"] is not None:                            # 1x1 conv residual
            wc = wc.at[Cmax:Cmax + cin, Cmax:Cmax + cout].set(p["wd"][:, :, 0].T)
            bres = p["bd"]
        else:                                              # identity residual
            assert cin == cout
            wc = wc.at[Cmax:Cmax + cin, Cmax:Cmax + cout].set(
                jnp.eye(cin, dtype=jnp.float32))
            bres = jnp.zeros((cout,), jnp.float32)
        bc = jnp.zeros((2 * Cmax,), jnp.float32)
        bc = bc.at[:cout].set(p["b"]).at[Cmax:Cmax + cout].set(bres)
        wpack.append(wc)
        bpack.append(bc.reshape(1, 2 * Cmax))
    wpack = jnp.stack(wpack)                               # (nb, K*Cmax, 2*Cmax)
    bpack = jnp.stack(bpack)                               # (nb, 1, 2*Cmax)

    c_last = blocks[-1]["v"].shape[0]
    O = lin["w"].shape[0]
    OPAD = _round_up(max(O, LANE), LANE)
    # W[o, c*L + l] -> w3[l, c, o], zero-padded to (L, Cmax, OPAD).
    w3 = jnp.transpose(lin["w"].reshape(O, c_last, L), (2, 1, 0))
    w3 = jnp.pad(w3, ((0, 0), (0, Cmax - c_last), (0, OPAD - O)))
    b3 = jnp.pad(lin["b"], (0, OPAD - O)).reshape(1, OPAD)
    return dict(wpack=wpack, bpack=bpack, w3=w3, b3=b3,
                dilations=tuple(int(p["dilation"]) for p in blocks),
                K=K, Cmax=Cmax, OPAD=OPAD, O=O, L=L)


# ---------------------------------- kernel ---------------------------------------

def _make_tcn_kernel(dilations, L, TB, C, K, OPAD):
    nb = len(dilations)

    def kernel(x_ref, wp_ref, bp_ref, w3_ref, b3_ref, o_ref, im2_ref):
        h = x_ref[...]                                     # (TB, L, C) f32, channels-last
        for i in range(nb):                                # static unroll over blocks
            d = dilations[i]
            # im2col for conv1d(k=3, stride=1, dilation=d, padding='same'):
            # column group t holds x[l + (t-1)*d]; only the 2*d*C border elements are
            # zeroed (no full-buffer memset), and every data column group is fully
            # rewritten each block, so nothing stale survives dilation changes.
            im2_ref[:, 0:d, 0:C] = jnp.zeros((TB, d, C), jnp.float32)
            im2_ref[:, d:L, 0:C] = h[:, 0:L - d, :]
            im2_ref[:, :, C:2 * C] = h
            im2_ref[:, 0:L - d, 2 * C:3 * C] = h[:, d:L, :]
            im2_ref[:, L - d:L, 2 * C:3 * C] = jnp.zeros((TB, d, C), jnp.float32)

            # ONE MXU matmul per block: all K taps (contraction depth K*C) with the
            # 1x1-conv / identity residual fused into the extra C output columns.
            r = jax.lax.dot_general(
                im2_ref[...], wp_ref[i], (((2,), (0,)), ((), ())),
                preferred_element_type=jnp.float32)        # (TB, L, 2C)
            r = r + bp_ref[i:i + 1, :, :]                  # conv bias | residual bias
            out = jnp.maximum(r[:, :, 0:C], 0.0)           # conv -> ReLU (Dropout = id)
            h = jnp.maximum(out + r[:, :, C:2 * C], 0.0)   # + residual -> ReLU

        # out_proj with PyTorch flatten(1) folded into the weight layout:
        #   y[b, o] = b3[o] + sum_l  h[b, l, :] @ W3[l]        (W3[l] is (C, OPAD))
        # h is parked in the (now dead) first C columns of the im2col scratch so the
        # per-l operands are cheap strided VMEM loads; no flatten store-loop and no
        # separate flat scratch.
        im2_ref[:, :, 0:C] = h
        y = jnp.zeros((TB, OPAD), jnp.float32)
        for l in range(L):
            y = y + jax.lax.dot_general(
                im2_ref[:, l, 0:C], w3_ref[l], (((1,), (0,)), ((), ())),
                preferred_element_type=jnp.float32)
        o_ref[...] = y + b3_ref[...]                       # one dense (8,128) store

    return kernel


def tcn_forward(x, kp):
    """x: (B, input_dim) f32 -> (B, output_dim) f32, matching TCN.forward (inference)."""
    B, L = x.shape
    assert L == kp["L"]
    C, OPAD, O, K = kp["Cmax"], kp["OPAD"], kp["O"], kp["K"]
    dil = kp["dilations"]
    assert max(dil) < L, "dilation must be smaller than the sequence length"
    TB = SUBLANE
    Bp = _round_up(max(B, TB), TB)

    # Host-side layout only: pad batch to full sublane groups, channels to Cmax.
    xk = jnp.zeros((Bp, L, C), jnp.float32).at[:B, :, 0].set(x)

    nb = len(dil)
    flops = nb * 2 * Bp * L * (K * C) * (2 * C) + 2 * Bp * L * C * OPAD
    bytes_accessed = 4 * (xk.size + kp["wpack"].size + kp["bpack"].size
                          + kp["w3"].size + kp["b3"].size + Bp * OPAD)

    kernel = _make_tcn_kernel(dil, L, TB, C, K, OPAD)
    out = pl.pallas_call(
        kernel,
        out_shape=jax.ShapeDtypeStruct((Bp, OPAD), jnp.float32),
        # Batch-tile grid: one 8-row sublane group per step.  "parallel" lets the
        # runtime pipeline tiles and shard them across v7x's two TensorCores once
        # the batch grows past one tile (with B=2 -> Bp=8 there is a single step).
        grid=(Bp // TB,),
        in_specs=[
            pl.BlockSpec((TB, L, C), lambda i: (i, 0, 0)),
            pl.BlockSpec(kp["wpack"].shape, lambda i: (0, 0, 0)),
            pl.BlockSpec(kp["bpack"].shape, lambda i: (0, 0, 0)),
            pl.BlockSpec(kp["w3"].shape, lambda i: (0, 0, 0)),
            pl.BlockSpec(kp["b3"].shape, lambda i: (0, 0)),
        ],
        out_specs=pl.BlockSpec((TB, OPAD), lambda i: (i, 0)),
        scratch_shapes=[pltpu.VMEM((TB, L, K * C), jnp.float32)],   # im2col (+ parked h)
        compiler_params=pltpu.CompilerParams(
            dimension_semantics=("parallel",),
            # Actual residency is ~0.5 MiB; an explicit (generous) limit keeps the
            # kernel portable to v7x's smaller 64 MiB VMEM when shapes scale up.
            vmem_limit_bytes=8 * 1024 * 1024),
        cost_estimate=pl.CostEstimate(flops=int(flops), transcendentals=0,
                                      bytes_accessed=int(bytes_accessed)),
    )(xk, kp["wpack"], kp["bpack"], kp["w3"], kp["b3"])
    return out[:B, :O]


# --------------------------- synthetic params + reference ------------------------

def init_tcn_params(key, input_dim, output_dim, num_channels, kernel_size=3):
    """Deterministic synthetic parameters in PyTorch-native layout."""
    L, O = input_dim, output_dim
    blocks = []
    in_ch = 1
    for i, out_ch in enumerate(num_channels):
        key, k1, k2, k3, k4, k5 = jax.random.split(key, 6)
        v = 0.3 * jax.random.normal(k1, (out_ch, in_ch, kernel_size), jnp.float32)
        g = 1.0 + 0.1 * jax.random.normal(k2, (out_ch, 1, 1), jnp.float32)
        b = 0.1 * jax.random.normal(k3, (out_ch,), jnp.float32)
        if in_ch != out_ch:
            wd = 0.3 * jax.random.normal(k4, (out_ch, in_ch, 1), jnp.float32)
            bd = 0.1 * jax.random.normal(k5, (out_ch,), jnp.float32)
        else:
            wd, bd = None, None
        blocks.append(dict(v=v, g=g, b=b, wd=wd, bd=bd, dilation=2 ** i))
        in_ch = out_ch
    key, kw, kb = jax.random.split(key, 3)
    feat = L * num_channels[-1]
    w = (1.0 / jnp.sqrt(feat)) * jax.random.normal(kw, (O, feat), jnp.float32)
    b = 0.1 * jax.random.normal(kb, (O,), jnp.float32)
    return blocks, dict(w=w, b=b)


def tcn_reference(x, blocks, lin):
    """Pure-JAX (XLA, channels-first) mirror of TCN.forward, to validate the kernel."""
    hi = jax.lax.Precision.HIGHEST
    B, L = x.shape
    h = x[:, None, :]                                      # (B, 1, L)
    for p in blocks:
        d = int(p["dilation"])
        w = _fold_weight_norm(p["v"], p["g"])              # (cout, cin, K)
        out = jax.lax.conv_general_dilated(
            h, w, window_strides=(1,), padding=[(d, d)], rhs_dilation=(d,),
            dimension_numbers=("NCH", "OIH", "NCH"), precision=hi)
        out = jnp.maximum(out + p["b"][None, :, None], 0.0)
        if p["wd"] is None:
            res = h
        else:
            res = jnp.einsum("oc,bcl->bol", p["wd"][:, :, 0], h,
                             precision=hi) + p["bd"][None, :, None]
        h = jnp.maximum(out + res, 0.0)
    flat = h.reshape(B, -1)                                # torch flatten(1): c*L + l
    return jnp.dot(flat, lin["w"].T, precision=hi) + lin["b"]


if __name__ == "__main__":
    B = 2
    input_dim = 16            # sequence length L (also the Linear's L factor)
    output_dim = 3
    num_channels = [4, 8, 8]  # last block exercises the identity-residual path

    key = jax.random.PRNGKey(0)
    key, kx, kp_key = jax.random.split(key, 3)
    x = jax.random.normal(kx, (B, input_dim), jnp.float32)

    blocks, lin = init_tcn_params(kp_key, input_dim, output_dim, num_channels)
    kparams = pack_params(blocks, lin, input_dim)

    y = jax.block_until_ready(tcn_forward(x, kparams))
    assert y.shape == (B, output_dim), y.shape

    y_ref = jax.block_until_ready(tcn_reference(x, blocks, lin))
    # Tight f32 tolerance (kernel and reference are both full-f32).
    assert bool(jnp.allclose(y, y_ref, atol=1e-4, rtol=1e-4)), (y, y_ref)
    print("KERNEL_OK")
</pallas_src>

<mosaic_0001>
module attributes {stable_mosaic.version = 11 : i64} {
  func.func @kernel(%arg0: i32, %arg1: memref<8x16x8xf32, #tpu.memory_space<vmem>>, %arg2: memref<3x24x16xf32, #tpu.memory_space<vmem>>, %arg3: memref<3x1x16xf32, #tpu.memory_space<vmem>>, %arg4: memref<16x8x128xf32, #tpu.memory_space<vmem>>, %arg5: memref<1x128xf32, #tpu.memory_space<vmem>>, %arg6: memref<8x128xf32, #tpu.memory_space<vmem>>, %arg7: memref<8x16x24xf32, #tpu.memory_space<vmem>>) attributes {dimension_semantics = [#tpu.dimension_semantics<parallel>], iteration_bounds = array<i64: 1>, scalar_prefetch = 0 : i64, scratch_operands = 1 : i64, tpu.core_type = #tpu.core_type<tc>, window_params = [{transform_indices = @transform_0, window_bounds = array<i64: 8, 16, 8>}, {pipeline_mode = #tpu.pipeline_mode<synchronous>, transform_indices = @transform_1, window_bounds = array<i64: 3, 24, 16>}, {pipeline_mode = #tpu.pipeline_mode<synchronous>, transform_indices = @transform_2, window_bounds = array<i64: 3, 1, 16>}, {pipeline_mode = #tpu.pipeline_mode<synchronous>, transform_indices = @transform_3, window_bounds = array<i64: 16, 8, 128>}, {pipeline_mode = #tpu.pipeline_mode<synchronous>, transform_indices = @transform_4, window_bounds = array<i64: 1, 128>}, {transform_indices = @transform_5, window_bounds = array<i64: 8, 128>}]} {
    %c0 = arith.constant 0 : index
    %c0_0 = arith.constant 0 : index
    %c0_1 = arith.constant 0 : index
    %0 = vector.load %arg1[%c0, %c0_0, %c0_1] : memref<8x16x8xf32, #tpu.memory_space<vmem>>, vector<8x16x8xf32>
    %cst = arith.constant 0.000000e+00 : f32
    %1 = vector.broadcast %cst : f32 to vector<8x1x8xf32>
    %c0_2 = arith.constant 0 : index
    %c0_3 = arith.constant 0 : index
    %c0_4 = arith.constant 0 : index
    %2 = vector.load %arg7[%c0_2, %c0_3, %c0_4] : memref<8x16x24xf32, #tpu.memory_space<vmem>>, vector<8x1x8xf32>
    tpu.vector_store %arg7[%c0_2, %c0_3, %c0_4], %1 {strides = array<i32>} : memref<8x16x24xf32, #tpu.memory_space<vmem>>, vector<8x1x8xf32>,
    %3 = vector.extract_strided_slice %0 {offsets = [0, 0, 0], sizes = [8, 15, 8], strides = [1, 1, 1]} : vector<8x16x8xf32> to vector<8x15x8xf32>
    %c0_5 = arith.constant 0 : index
    %c1 = arith.constant 1 : index
    %c0_6 = arith.constant 0 : index
    %4 = vector.load %arg7[%c0_5, %c1, %c0_6] : memref<8x16x24xf32, #tpu.memory_space<vmem>>, vector<8x15x8xf32>
    tpu.vector_store %arg7[%c0_5, %c1, %c0_6], %3 {strides = array<i32>} : memref<8x16x24xf32, #tpu.memory_space<vmem>>, vector<8x15x8xf32>,
    %c0_7 = arith.constant 0 : index
    %c0_8 = arith.constant 0 : index
    %c8 = arith.constant 8 : index
    %5 = vector.load %arg7[%c0_7, %c0_8, %c8] : memref<8x16x24xf32, #tpu.memory_space<vmem>>, vector<8x16x8xf32>
    tpu.vector_store %arg7[%c0_7, %c0_8, %c8], %0 {strides = array<i32>} : memref<8x16x24xf32, #tpu.memory_space<vmem>>, vector<8x16x8xf32>,
    %6 = vector.extract_strided_slice %0 {offsets = [0, 1, 0], sizes = [8, 15, 8], strides = [1, 1, 1]} : vector<8x16x8xf32> to vector<8x15x8xf32>
    %c0_9 = arith.constant 0 : index
    %c0_10 = arith.constant 0 : index
    %c16 = arith.constant 16 : index
    %7 = vector.load %arg7[%c0_9, %c0_10, %c16] : memref<8x16x24xf32, #tpu.memory_space<vmem>>, vector<8x15x8xf32>
    tpu.vector_store %arg7[%c0_9, %c0_10, %c16], %6 {strides = array<i32>} : memref<8x16x24xf32, #tpu.memory_space<vmem>>, vector<8x15x8xf32>,
    %cst_11 = arith.constant 0.000000e+00 : f32
    %8 = vector.broadcast %cst_11 : f32 to vector<8x1x8xf32>
    %c0_12 = arith.constant 0 : index
    %c15 = arith.constant 15 : index
    %c16_13 = arith.constant 16 : index
    %9 = vector.load %arg7[%c0_12, %c15, %c16_13] : memref<8x16x24xf32, #tpu.memory_space<vmem>>, vector<8x1x8xf32>
    tpu.vector_store %arg7[%c0_12, %c15, %c16_13], %8 {strides = array<i32>} : memref<8x16x24xf32, #tpu.memory_space<vmem>>, vector<8x1x8xf32>,
    %c0_14 = arith.constant 0 : index
    %c0_15 = arith.constant 0 : index
    %c0_16 = arith.constant 0 : index
    %10 = vector.load %arg7[%c0_14, %c0_15, %c0_16] : memref<8x16x24xf32, #tpu.memory_space<vmem>>, vector<8x16x24xf32>
    %c0_17 = arith.constant 0 : index
    %c0_18 = arith.constant 0 : index
    %c0_19 = arith.constant 0 : index
    %11 = vector.load %arg2[%c0_17, %c0_18, %c0_19] : memref<3x24x16xf32, #tpu.memory_space<vmem>>, vector<1x24x16xf32>
    %12 = vector.shape_cast %11 : vector<1x24x16xf32> to vector<24x16xf32>
    %cst_20 = arith.constant dense<0.000000e+00> : vector<8x16x16xf32>
    %13 = tpu.matmul %10, %12, %cst_20 {dimension_numbers = #tpu.dot_dimension_numbers<[2], [0], [0, 1], [1], [0, 0, 0, 1, 1, 1], [], []>} : vector<8x16x24xf32>, vector<24x16xf32>, vector<8x16x16xf32> -> vector<8x16x16xf32>
    %c0_21 = arith.constant 0 : index
    %c0_22 = arith.constant 0 : index
    %c0_23 = arith.constant 0 : index
    %14 = vector.load %arg3[%c0_21, %c0_22, %c0_23] : memref<3x1x16xf32, #tpu.memory_space<vmem>>, vector<1x1x16xf32>
    %15 = vector.broadcast %14 : vector<1x1x16xf32> to vector<8x16x16xf32>
    %16 = arith.addf %13, %15 : vector<8x16x16xf32>
    %17 = vector.extract_strided_slice %16 {offsets = [0, 0, 0], sizes = [8, 16, 8], strides = [1, 1, 1]} : vector<8x16x16xf32> to vector<8x16x8xf32>
    %cst_24 = arith.constant 0.000000e+00 : f32
    %18 = vector.broadcast %cst_24 : f32 to vector<8x16x8xf32>
    %19 = arith.maximumf %17, %18 : vector<8x16x8xf32>
    %20 = vector.extract_strided_slice %16 {offsets = [0, 0, 8], sizes = [8, 16, 8], strides = [1, 1, 1]} : vector<8x16x16xf32> to vector<8x16x8xf32>
    %21 = arith.addf %19, %20 : vector<8x16x8xf32>
    %cst_25 = arith.constant 0.000000e+00 : f32
    %22 = vector.broadcast %cst_25 : f32 to vector<8x16x8xf32>
    %23 = arith.maximumf %21, %22 : vector<8x16x8xf32>
    %cst_26 = arith.constant 0.000000e+00 : f32
    %24 = vector.broadcast %cst_26 : f32 to vector<8x2x8xf32>
    %c0_27 = arith.constant 0 : index
    %c0_28 = arith.constant 0 : index
    %c0_29 = arith.constant 0 : index
    %25 = vector.load %arg7[%c0_27, %c0_28, %c0_29] : memref<8x16x24xf32, #tpu.memory_space<vmem>>, vector<8x2x8xf32>
    tpu.vector_store %arg7[%c0_27, %c0_28, %c0_29], %24 {strides = array<i32>} : memref<8x16x24xf32, #tpu.memory_space<vmem>>, vector<8x2x8xf32>,
    %26 = vector.extract_strided_slice %23 {offsets = [0, 0, 0], sizes = [8, 14, 8], strides = [1, 1, 1]} : vector<8x16x8xf32> to vector<8x14x8xf32>
    %c0_30 = arith.constant 0 : index
    %c2 = arith.constant 2 : index
    %c0_31 = arith.constant 0 : index
    %27 = vector.load %arg7[%c0_30, %c2, %c0_31] : memref<8x16x24xf32, #tpu.memory_space<vmem>>, vector<8x14x8xf32>
    tpu.vector_store %arg7[%c0_30, %c2, %c0_31], %26 {strides = array<i32>} : memref<8x16x24xf32, #tpu.memory_space<vmem>>, vector<8x14x8xf32>,
    %c0_32 = arith.constant 0 : index
    %c0_33 = arith.constant 0 : index
    %c8_34 = arith.constant 8 : index
    %28 = vector.load %arg7[%c0_32, %c0_33, %c8_34] : memref<8x16x24xf32, #tpu.memory_space<vmem>>, vector<8x16x8xf32>
    tpu.vector_store %arg7[%c0_32, %c0_33, %c8_34], %23 {strides = array<i32>} : memref<8x16x24xf32, #tpu.memory_space<vmem>>, vector<8x16x8xf32>,
    %29 = vector.extract_strided_slice %23 {offsets = [0, 2, 0], sizes = [8, 14, 8], strides = [1, 1, 1]} : vector<8x16x8xf32> to vector<8x14x8xf32>
    %c0_35 = arith.constant 0 : index
    %c0_36 = arith.constant 0 : index
    %c16_37 = arith.constant 16 : index
    %30 = vector.load %arg7[%c0_35, %c0_36, %c16_37] : memref<8x16x24xf32, #tpu.memory_space<vmem>>, vector<8x14x8xf32>
    tpu.vector_store %arg7[%c0_35, %c0_36, %c16_37], %29 {strides = array<i32>} : memref<8x16x24xf32, #tpu.memory_space<vmem>>, vector<8x14x8xf32>,
    %cst_38 = arith.constant 0.000000e+00 : f32
    %31 = vector.broadcast %cst_38 : f32 to vector<8x2x8xf32>
    %c0_39 = arith.constant 0 : index
    %c14 = arith.constant 14 : index
    %c16_40 = arith.constant 16 : index
    %32 = vector.load %arg7[%c0_39, %c14, %c16_40] : memref<8x16x24xf32, #tpu.memory_space<vmem>>, vector<8x2x8xf32>
    tpu.vector_store %arg7[%c0_39, %c14, %c16_40], %31 {strides = array<i32>} : memref<8x16x24xf32, #tpu.memory_space<vmem>>, vector<8x2x8xf32>,
    %c0_41 = arith.constant 0 : index
    %c0_42 = arith.constant 0 : index
    %c0_43 = arith.constant 0 : index
    %33 = vector.load %arg7[%c0_41, %c0_42, %c0_43] : memref<8x16x24xf32, #tpu.memory_space<vmem>>, vector<8x16x24xf32>
    %c1_44 = arith.constant 1 : index
    %c0_45 = arith.constant 0 : index
    %c0_46 = arith.constant 0 : index
    %34 = vector.load %arg2[%c1_44, %c0_45, %c0_46] : memref<3x24x16xf32, #tpu.memory_space<vmem>>, vector<1x24x16xf32>
    %35 = vector.shape_cast %34 : vector<1x24x16xf32> to vector<24x16xf32>
    %cst_47 = arith.constant dense<0.000000e+00> : vector<8x16x16xf32>
    %36 = tpu.matmul %33, %35, %cst_47 {dimension_numbers = #tpu.dot_dimension_numbers<[2], [0], [0, 1], [1], [0, 0, 0, 1, 1, 1], [], []>} : vector<8x16x24xf32>, vector<24x16xf32>, vector<8x16x16xf32> -> vector<8x16x16xf32>
    %c1_48 = arith.constant 1 : index
    %c0_49 = arith.constant 0 : index
    %c0_50 = arith.constant 0 : index
    %37 = vector.load %arg3[%c1_48, %c0_49, %c0_50] : memref<3x1x16xf32, #tpu.memory_space<vmem>>, vector<1x1x16xf32>
    %38 = vector.broadcast %37 : vector<1x1x16xf32> to vector<8x16x16xf32>
    %39 = arith.addf %36, %38 : vector<8x16x16xf32>
    %40 = vector.extract_strided_slice %39 {offsets = [0, 0, 0], sizes = [8, 16, 8], strides = [1, 1, 1]} : vector<8x16x16xf32> to vector<8x16x8xf32>
    %cst_51 = arith.constant 0.000000e+00 : f32
    %41 = vector.broadcast %cst_51 : f32 to vector<8x16x8xf32>
    %42 = arith.maximumf %40, %41 : vector<8x16x8xf32>
    %43 = vector.extract_strided_slice %39 {offsets = [0, 0, 8], sizes = [8, 16, 8], strides = [1, 1, 1]} : vector<8x16x16xf32> to vector<8x16x8xf32>
    %44 = arith.addf %42, %43 : vector<8x16x8xf32>
    %cst_52 = arith.constant 0.000000e+00 : f32
    %45 = vector.broadcast %cst_52 : f32 to vector<8x16x8xf32>
    %46 = arith.maximumf %44, %45 : vector<8x16x8xf32>
    %cst_53 = arith.constant 0.000000e+00 : f32
    %47 = vector.broadcast %cst_53 : f32 to vector<8x4x8xf32>
    %c0_54 = arith.constant 0 : index
    %c0_55 = arith.constant 0 : index
    %c0_56 = arith.constant 0 : index
    %48 = vector.load %arg7[%c0_54, %c0_55, %c0_56] : memref<8x16x24xf32, #tpu.memory_space<vmem>>, vector<8x4x8xf32>
    tpu.vector_store %arg7[%c0_54, %c0_55, %c0_56], %47 {strides = array<i32>} : memref<8x16x24xf32, #tpu.memory_space<vmem>>, vector<8x4x8xf32>,
    %49 = vector.extract_strided_slice %46 {offsets = [0, 0, 0], sizes = [8, 12, 8], strides = [1, 1, 1]} : vector<8x16x8xf32> to vector<8x12x8xf32>
    %c0_57 = arith.constant 0 : index
    %c4 = arith.constant 4 : index
    %c0_58 = arith.constant 0 : index
    %50 = vector.load %arg7[%c0_57, %c4, %c0_58] : memref<8x16x24xf32, #tpu.memory_space<vmem>>, vector<8x12x8xf32>
    tpu.vector_store %arg7[%c0_57, %c4, %c0_58], %49 {strides = array<i32>} : memref<8x16x24xf32, #tpu.memory_space<vmem>>, vector<8x12x8xf32>,
    %c0_59 = arith.constant 0 : index
    %c0_60 = arith.constant 0 : index
    %c8_61 = arith.constant 8 : index
    %51 = vector.load %arg7[%c0_59, %c0_60, %c8_61] : memref<8x16x24xf32, #tpu.memory_space<vmem>>, vector<8x16x8xf32>
    tpu.vector_store %arg7[%c0_59, %c0_60, %c8_61], %46 {strides = array<i32>} : memref<8x16x24xf32, #tpu.memory_space<vmem>>, vector<8x16x8xf32>,
    %52 = vector.extract_strided_slice %46 {offsets = [0, 4, 0], sizes = [8, 12, 8], strides = [1, 1, 1]} : vector<8x16x8xf32> to vector<8x12x8xf32>
    %c0_62 = arith.constant 0 : index
    %c0_63 = arith.constant 0 : index
    %c16_64 = arith.constant 16 : index
    %53 = vector.load %arg7[%c0_62, %c0_63, %c16_64] : memref<8x16x24xf32, #tpu.memory_space<vmem>>, vector<8x12x8xf32>
    tpu.vector_store %arg7[%c0_62, %c0_63, %c16_64], %52 {strides = array<i32>} : memref<8x16x24xf32, #tpu.memory_space<vmem>>, vector<8x12x8xf32>,
    %cst_65 = arith.constant 0.000000e+00 : f32
    %54 = vector.broadcast %cst_65 : f32 to vector<8x4x8xf32>
    %c0_66 = arith.constant 0 : index
    %c12 = arith.constant 12 : index
    %c16_67 = arith.constant 16 : index
    %55 = vector.load %arg7[%c0_66, %c12, %c16_67] : memref<8x16x24xf32, #tpu.memory_space<vmem>>, vector<8x4x8xf32>
    tpu.vector_store %arg7[%c0_66, %c12, %c16_67], %54 {strides = array<i32>} : memref<8x16x24xf32, #tpu.memory_space<vmem>>, vector<8x4x8xf32>,
    %c0_68 = arith.constant 0 : index
    %c0_69 = arith.constant 0 : index
    %c0_70 = arith.constant 0 : index
    %56 = vector.load %arg7[%c0_68, %c0_69, %c0_70] : memref<8x16x24xf32, #tpu.memory_space<vmem>>, vector<8x16x24xf32>
    %c2_71 = arith.constant 2 : index
    %c0_72 = arith.constant 0 : index
    %c0_73 = arith.constant 0 : index
    %57 = vector.load %arg2[%c2_71, %c0_72, %c0_73] : memref<3x24x16xf32, #tpu.memory_space<vmem>>, vector<1x24x16xf32>
    %58 = vector.shape_cast %57 : vector<1x24x16xf32> to vector<24x16xf32>
    %cst_74 = arith.constant dense<0.000000e+00> : vector<8x16x16xf32>
    %59 = tpu.matmul %56, %58, %cst_74 {dimension_numbers = #tpu.dot_dimension_numbers<[2], [0], [0, 1], [1], [0, 0, 0, 1, 1, 1], [], []>} : vector<8x16x24xf32>, vector<24x16xf32>, vector<8x16x16xf32> -> vector<8x16x16xf32>
    %c2_75 = arith.constant 2 : index
    %c0_76 = arith.constant 0 : index
    %c0_77 = arith.constant 0 : index
    %60 = vector.load %arg3[%c2_75, %c0_76, %c0_77] : memref<3x1x16xf32, #tpu.memory_space<vmem>>, vector<1x1x16xf32>
    %61 = vector.broadcast %60 : vector<1x1x16xf32> to vector<8x16x16xf32>
    %62 = arith.addf %59, %61 : vector<8x16x16xf32>
    %63 = vector.extract_strided_slice %62 {offsets = [0, 0, 0], sizes = [8, 16, 8], strides = [1, 1, 1]} : vector<8x16x16xf32> to vector<8x16x8xf32>
    %cst_78 = arith.constant 0.000000e+00 : f32
    %64 = vector.broadcast %cst_78 : f32 to vector<8x16x8xf32>
    %65 = arith.maximumf %63, %64 : vector<8x16x8xf32>
    %66 = vector.extract_strided_slice %62 {offsets = [0, 0, 8], sizes = [8, 16, 8], strides = [1, 1, 1]} : vector<8x16x16xf32> to vector<8x16x8xf32>
    %67 = arith.addf %65, %66 : vector<8x16x8xf32>
    %cst_79 = arith.constant 0.000000e+00 : f32
    %68 = vector.broadcast %cst_79 : f32 to vector<8x16x8xf32>
    %69 = arith.maximumf %67, %68 : vector<8x16x8xf32>
    %c0_80 = arith.constant 0 : index
    %c0_81 = arith.constant 0 : index
    %c0_82 = arith.constant 0 : index
    %70 = vector.load %arg7[%c0_80, %c0_81, %c0_82] : memref<8x16x24xf32, #tpu.memory_space<vmem>>, vector<8x16x8xf32>
    tpu.vector_store %arg7[%c0_80, %c0_81, %c0_82], %69 {strides = array<i32>} : memref<8x16x24xf32, #tpu.memory_space<vmem>>, vector<8x16x8xf32>,
    %cst_83 = arith.constant 0.000000e+00 : f32
    %71 = vector.broadcast %cst_83 : f32 to vector<8x128xf32>
    %c0_84 = arith.constant 0 : index
    %c0_85 = arith.constant 0 : index
    %c0_86 = arith.constant 0 : index
    %72 = vector.load %arg7[%c0_84, %c0_85, %c0_86] : memref<8x16x24xf32, #tpu.memory_space<vmem>>, vector<8x1x8xf32>
    %73 = vector.shape_cast %72 : vector<8x1x8xf32> to vector<8x8xf32>
    %c0_87 = arith.constant 0 : index
    %c0_88 = arith.constant 0 : index
    %c0_89 = arith.constant 0 : index
    %74 = vector.load %arg4[%c0_87, %c0_88, %c0_89] : memref<16x8x128xf32, #tpu.memory_space<vmem>>, vector<1x8x128xf32>
    %75 = vector.shape_cast %74 : vector<1x8x128xf32> to vector<8x128xf32>
    %cst_90 = arith.constant dense<0.000000e+00> : vector<8x128xf32>
    %76 = tpu.matmul %73, %75, %cst_90 {dimension_numbers = #tpu.dot_dimension_numbers<[1], [0], [0], [1], [0, 0, 1, 1], [], []>} : vector<8x8xf32>, vector<8x128xf32>, vector<8x128xf32> -> vector<8x128xf32>
    %77 = arith.addf %71, %76 : vector<8x128xf32>
    %c0_91 = arith.constant 0 : index
    %c1_92 = arith.constant 1 : index
    %c0_93 = arith.constant 0 : index
    %78 = vector.load %arg7[%c0_91, %c1_92, %c0_93] : memref<8x16x24xf32, #tpu.memory_space<vmem>>, vector<8x1x8xf32>
    %79 = vector.shape_cast %78 : vector<8x1x8xf32> to vector<8x8xf32>
    %c1_94 = arith.constant 1 : index
    %c0_95 = arith.constant 0 : index
    %c0_96 = arith.constant 0 : index
    %80 = vector.load %arg4[%c1_94, %c0_95, %c0_96] : memref<16x8x128xf32, #tpu.memory_space<vmem>>, vector<1x8x128xf32>
    %81 = vector.shape_cast %80 : vector<1x8x128xf32> to vector<8x128xf32>
    %cst_97 = arith.constant dense<0.000000e+00> : vector<8x128xf32>
    %82 = tpu.matmul %79, %81, %cst_97 {dimension_numbers = #tpu.dot_dimension_numbers<[1], [0], [0], [1], [0, 0, 1, 1], [], []>} : vector<8x8xf32>, vector<8x128xf32>, vector<8x128xf32> -> vector<8x128xf32>
    %83 = arith.addf %77, %82 : vector<8x128xf32>
    %c0_98 = arith.constant 0 : index
    %c2_99 = arith.constant 2 : index
    %c0_100 = arith.constant 0 : index
    %84 = vector.load %arg7[%c0_98, %c2_99, %c0_100] : memref<8x16x24xf32, #tpu.memory_space<vmem>>, vector<8x1x8xf32>
    %85 = vector.shape_cast %84 : vector<8x1x8xf32> to vector<8x8xf32>
    %c2_101 = arith.constant 2 : index
    %c0_102 = arith.constant 0 : index
    %c0_103 = arith.constant 0 : index
    %86 = vector.load %arg4[%c2_101, %c0_102, %c0_103] : memref<16x8x128xf32, #tpu.memory_space<vmem>>, vector<1x8x128xf32>
    %87 = vector.shape_cast %86 : vector<1x8x128xf32> to vector<8x128xf32>
    %cst_104 = arith.constant dense<0.000000e+00> : vector<8x128xf32>
    %88 = tpu.matmul %85, %87, %cst_104 {dimension_numbers = #tpu.dot_dimension_numbers<[1], [0], [0], [1], [0, 0, 1, 1], [], []>} : vector<8x8xf32>, vector<8x128xf32>, vector<8x128xf32> -> vector<8x128xf32>
    %89 = arith.addf %83, %88 : vector<8x128xf32>
    %c0_105 = arith.constant 0 : index
    %c3 = arith.constant 3 : index
    %c0_106 = arith.constant 0 : index
    %90 = vector.load %arg7[%c0_105, %c3, %c0_106] : memref<8x16x24xf32, #tpu.memory_space<vmem>>, vector<8x1x8xf32>
    %91 = vector.shape_cast %90 : vector<8x1x8xf32> to vector<8x8xf32>
    %c3_107 = arith.constant 3 : index
    %c0_108 = arith.constant 0 : index
    %c0_109 = arith.constant 0 : index
    %92 = vector.load %arg4[%c3_107, %c0_108, %c0_109] : memref<16x8x128xf32, #tpu.memory_space<vmem>>, vector<1x8x128xf32>
    %93 = vector.shape_cast %92 : vector<1x8x128xf32> to vector<8x128xf32>
    %cst_110 = arith.constant dense<0.000000e+00> : vector<8x128xf32>
    %94 = tpu.matmul %91, %93, %cst_110 {dimension_numbers = #tpu.dot_dimension_numbers<[1], [0], [0], [1], [0, 0, 1, 1], [], []>} : vector<8x8xf32>, vector<8x128xf32>, vector<8x128xf32> -> vector<8x128xf32>
    %95 = arith.addf %89, %94 : vector<8x128xf32>
    %c0_111 = arith.constant 0 : index
    %c4_112 = arith.constant 4 : index
    %c0_113 = arith.constant 0 : index
    %96 = vector.load %arg7[%c0_111, %c4_112, %c0_113] : memref<8x16x24xf32, #tpu.memory_space<vmem>>, vector<8x1x8xf32>
    %97 = vector.shape_cast %96 : vector<8x1x8xf32> to vector<8x8xf32>
    %c4_114 = arith.constant 4 : index
    %c0_115 = arith.constant 0 : index
    %c0_116 = arith.constant 0 : index
    %98 = vector.load %arg4[%c4_114, %c0_115, %c0_116] : memref<16x8x128xf32, #tpu.memory_space<vmem>>, vector<1x8x128xf32>
    %99 = vector.shape_cast %98 : vector<1x8x128xf32> to vector<8x128xf32>
    %cst_117 = arith.constant dense<0.000000e+00> : vector<8x128xf32>
    %100 = tpu.matmul %97, %99, %cst_117 {dimension_numbers = #tpu.dot_dimension_numbers<[1], [0], [0], [1], [0, 0, 1, 1], [], []>} : vector<8x8xf32>, vector<8x128xf32>, vector<8x128xf32> -> vector<8x128xf32>
    %101 = arith.addf %95, %100 : vector<8x128xf32>
    %c0_118 = arith.constant 0 : index
    %c5 = arith.constant 5 : index
    %c0_119 = arith.constant 0 : index
    %102 = vector.load %arg7[%c0_118, %c5, %c0_119] : memref<8x16x24xf32, #tpu.memory_space<vmem>>, vector<8x1x8xf32>
    %103 = vector.shape_cast %102 : vector<8x1x8xf32> to vector<8x8xf32>
    %c5_120 = arith.constant 5 : index
    %c0_121 = arith.constant 0 : index
    %c0_122 = arith.constant 0 : index
    %104 = vector.load %arg4[%c5_120, %c0_121, %c0_122] : memref<16x8x128xf32, #tpu.memory_space<vmem>>, vector<1x8x128xf32>
    %105 = vector.shape_cast %104 : vector<1x8x128xf32> to vector<8x128xf32>
    %cst_123 = arith.constant dense<0.000000e+00> : vector<8x128xf32>
    %106 = tpu.matmul %103, %105, %cst_123 {dimension_numbers = #tpu.dot_dimension_numbers<[1], [0], [0], [1], [0, 0, 1, 1], [], []>} : vector<8x8xf32>, vector<8x128xf32>, vector<8x128xf32> -> vector<8x128xf32>
    %107 = arith.addf %101, %106 : vector<8x128xf32>
    %c0_124 = arith.constant 0 : index
    %c6 = arith.constant 6 : index
    %c0_125 = arith.constant 0 : index
    %108 = vector.load %arg7[%c0_124, %c6, %c0_125] : memref<8x16x24xf32, #tpu.memory_space<vmem>>, vector<8x1x8xf32>
    %109 = vector.shape_cast %108 : vector<8x1x8xf32> to vector<8x8xf32>
    %c6_126 = arith.constant 6 : index
    %c0_127 = arith.constant 0 : index
    %c0_128 = arith.constant 0 : index
    %110 = vector.load %arg4[%c6_126, %c0_127, %c0_128] : memref<16x8x128xf32, #tpu.memory_space<vmem>>, vector<1x8x128xf32>
    %111 = vector.shape_cast %110 : vector<1x8x128xf32> to vector<8x128xf32>
    %cst_129 = arith.constant dense<0.000000e+00> : vector<8x128xf32>
    %112 = tpu.matmul %109, %111, %cst_129 {dimension_numbers = #tpu.dot_dimension_numbers<[1], [0], [0], [1], [0, 0, 1, 1], [], []>} : vector<8x8xf32>, vector<8x128xf32>, vector<8x128xf32> -> vector<8x128xf32>
    %113 = arith.addf %107, %112 : vector<8x128xf32>
    %c0_130 = arith.constant 0 : index
    %c7 = arith.constant 7 : index
    %c0_131 = arith.constant 0 : index
    %114 = vector.load %arg7[%c0_130, %c7, %c0_131] : memref<8x16x24xf32, #tpu.memory_space<vmem>>, vector<8x1x8xf32>
    %115 = vector.shape_cast %114 : vector<8x1x8xf32> to vector<8x8xf32>
    %c7_132 = arith.constant 7 : index
    %c0_133 = arith.constant 0 : index
    %c0_134 = arith.constant 0 : index
    %116 = vector.load %arg4[%c7_132, %c0_133, %c0_134] : memref<16x8x128xf32, #tpu.memory_space<vmem>>, vector<1x8x128xf32>
    %117 = vector.shape_cast %116 : vector<1x8x128xf32> to vector<8x128xf32>
    %cst_135 = arith.constant dense<0.000000e+00> : vector<8x128xf32>
    %118 = tpu.matmul %115, %117, %cst_135 {dimension_numbers = #tpu.dot_dimension_numbers<[1], [0], [0], [1], [0, 0, 1, 1], [], []>} : vector<8x8xf32>, vector<8x128xf32>, vector<8x128xf32> -> vector<8x128xf32>
    %119 = arith.addf %113, %118 : vector<8x128xf32>
    %c0_136 = arith.constant 0 : index
    %c8_137 = arith.constant 8 : index
    %c0_138 = arith.constant 0 : index
    %120 = vector.load %arg7[%c0_136, %c8_137, %c0_138] : memref<8x16x24xf32, #tpu.memory_space<vmem>>, vector<8x1x8xf32>
    %121 = vector.shape_cast %120 : vector<8x1x8xf32> to vector<8x8xf32>
    %c8_139 = arith.constant 8 : index
    %c0_140 = arith.constant 0 : index
    %c0_141 = arith.constant 0 : index
    %122 = vector.load %arg4[%c8_139, %c0_140, %c0_141] : memref<16x8x128xf32, #tpu.memory_space<vmem>>, vector<1x8x128xf32>
    %123 = vector.shape_cast %122 : vector<1x8x128xf32> to vector<8x128xf32>
    %cst_142 = arith.constant dense<0.000000e+00> : vector<8x128xf32>
    %124 = tpu.matmul %121, %123, %cst_142 {dimension_numbers = #tpu.dot_dimension_numbers<[1], [0], [0], [1], [0, 0, 1, 1], [], []>} : vector<8x8xf32>, vector<8x128xf32>, vector<8x128xf32> -> vector<8x128xf32>
    %125 = arith.addf %119, %124 : vector<8x128xf32>
    %c0_143 = arith.constant 0 : index
    %c9 = arith.constant 9 : index
    %c0_144 = arith.constant 0 : index
    %126 = vector.load %arg7[%c0_143, %c9, %c0_144] : memref<8x16x24xf32, #tpu.memory_space<vmem>>, vector<8x1x8xf32>
    %127 = vector.shape_cast %126 : vector<8x1x8xf32> to vector<8x8xf32>
    %c9_145 = arith.constant 9 : index
    %c0_146 = arith.constant 0 : index
    %c0_147 = arith.constant 0 : index
    %128 = vector.load %arg4[%c9_145, %c0_146, %c0_147] : memref<16x8x128xf32, #tpu.memory_space<vmem>>, vector<1x8x128xf32>
    %129 = vector.shape_cast %128 : vector<1x8x128xf32> to vector<8x128xf32>
    %cst_148 = arith.constant dense<0.000000e+00> : vector<8x128xf32>
    %130 = tpu.matmul %127, %129, %cst_148 {dimension_numbers = #tpu.dot_dimension_numbers<[1], [0], [0], [1], [0, 0, 1, 1], [], []>} : vector<8x8xf32>, vector<8x128xf32>, vector<8x128xf32> -> vector<8x128xf32>
    %131 = arith.addf %125, %130 : vector<8x128xf32>
    %c0_149 = arith.constant 0 : index
    %c10 = arith.constant 10 : index
    %c0_150 = arith.constant 0 : index
    %132 = vector.load %arg7[%c0_149, %c10, %c0_150] : memref<8x16x24xf32, #tpu.memory_space<vmem>>, vector<8x1x8xf32>
    %133 = vector.shape_cast %132 : vector<8x1x8xf32> to vector<8x8xf32>
    %c10_151 = arith.constant 10 : index
    %c0_152 = arith.constant 0 : index
    %c0_153 = arith.constant 0 : index
    %134 = vector.load %arg4[%c10_151, %c0_152, %c0_153] : memref<16x8x128xf32, #tpu.memory_space<vmem>>, vector<1x8x128xf32>
    %135 = vector.shape_cast %134 : vector<1x8x128xf32> to vector<8x128xf32>
    %cst_154 = arith.constant dense<0.000000e+00> : vector<8x128xf32>
    %136 = tpu.matmul %133, %135, %cst_154 {dimension_numbers = #tpu.dot_dimension_numbers<[1], [0], [0], [1], [0, 0, 1, 1], [], []>} : vector<8x8xf32>, vector<8x128xf32>, vector<8x128xf32> -> vector<8x128xf32>
    %137 = arith.addf %131, %136 : vector<8x128xf32>
    %c0_155 = arith.constant 0 : index
    %c11 = arith.constant 11 : index
    %c0_156 = arith.constant 0 : index
    %138 = vector.load %arg7[%c0_155, %c11, %c0_156] : memref<8x16x24xf32, #tpu.memory_space<vmem>>, vector<8x1x8xf32>
    %139 = vector.shape_cast %138 : vector<8x1x8xf32> to vector<8x8xf32>
    %c11_157 = arith.constant 11 : index
    %c0_158 = arith.constant 0 : index
    %c0_159 = arith.constant 0 : index
    %140 = vector.load %arg4[%c11_157, %c0_158, %c0_159] : memref<16x8x128xf32, #tpu.memory_space<vmem>>, vector<1x8x128xf32>
    %141 = vector.shape_cast %140 : vector<1x8x128xf32> to vector<8x128xf32>
    %cst_160 = arith.constant dense<0.000000e+00> : vector<8x128xf32>
    %142 = tpu.matmul %139, %141, %cst_160 {dimension_numbers = #tpu.dot_dimension_numbers<[1], [0], [0], [1], [0, 0, 1, 1], [], []>} : vector<8x8xf32>, vector<8x128xf32>, vector<8x128xf32> -> vector<8x128xf32>
    %143 = arith.addf %137, %142 : vector<8x128xf32>
    %c0_161 = arith.constant 0 : index
    %c12_162 = arith.constant 12 : index
    %c0_163 = arith.constant 0 : index
    %144 = vector.load %arg7[%c0_161, %c12_162, %c0_163] : memref<8x16x24xf32, #tpu.memory_space<vmem>>, vector<8x1x8xf32>
    %145 = vector.shape_cast %144 : vector<8x1x8xf32> to vector<8x8xf32>
    %c12_164 = arith.constant 12 : index
    %c0_165 = arith.constant 0 : index
    %c0_166 = arith.constant 0 : index
    %146 = vector.load %arg4[%c12_164, %c0_165, %c0_166] : memref<16x8x128xf32, #tpu.memory_space<vmem>>, vector<1x8x128xf32>
    %147 = vector.shape_cast %146 : vector<1x8x128xf32> to vector<8x128xf32>
    %cst_167 = arith.constant dense<0.000000e+00> : vector<8x128xf32>
    %148 = tpu.matmul %145, %147, %cst_167 {dimension_numbers = #tpu.dot_dimension_numbers<[1], [0], [0], [1], [0, 0, 1, 1], [], []>} : vector<8x8xf32>, vector<8x128xf32>, vector<8x128xf32> -> vector<8x128xf32>
    %149 = arith.addf %143, %148 : vector<8x128xf32>
    %c0_168 = arith.constant 0 : index
    %c13 = arith.constant 13 : index
    %c0_169 = arith.constant 0 : index
    %150 = vector.load %arg7[%c0_168, %c13, %c0_169] : memref<8x16x24xf32, #tpu.memory_space<vmem>>, vector<8x1x8xf32>
    %151 = vector.shape_cast %150 : vector<8x1x8xf32> to vector<8x8xf32>
    %c13_170 = arith.constant 13 : index
    %c0_171 = arith.constant 0 : index
    %c0_172 = arith.constant 0 : index
    %152 = vector.load %arg4[%c13_170, %c0_171, %c0_172] : memref<16x8x128xf32, #tpu.memory_space<vmem>>, vector<1x8x128xf32>
    %153 = vector.shape_cast %152 : vector<1x8x128xf32> to vector<8x128xf32>
    %cst_173 = arith.constant dense<0.000000e+00> : vector<8x128xf32>
    %154 = tpu.matmul %151, %153, %cst_173 {dimension_numbers = #tpu.dot_dimension_numbers<[1], [0], [0], [1], [0, 0, 1, 1], [], []>} : vector<8x8xf32>, vector<8x128xf32>, vector<8x128xf32> -> vector<8x128xf32>
    %155 = arith.addf %149, %154 : vector<8x128xf32>
    %c0_174 = arith.constant 0 : index
    %c14_175 = arith.constant 14 : index
    %c0_176 = arith.constant 0 : index
    %156 = vector.load %arg7[%c0_174, %c14_175, %c0_176] : memref<8x16x24xf32, #tpu.memory_space<vmem>>, vector<8x1x8xf32>
    %157 = vector.shape_cast %156 : vector<8x1x8xf32> to vector<8x8xf32>
    %c14_177 = arith.constant 14 : index
    %c0_178 = arith.constant 0 : index
    %c0_179 = arith.constant 0 : index
    %158 = vector.load %arg4[%c14_177, %c0_178, %c0_179] : memref<16x8x128xf32, #tpu.memory_space<vmem>>, vector<1x8x128xf32>
    %159 = vector.shape_cast %158 : vector<1x8x128xf32> to vector<8x128xf32>
    %cst_180 = arith.constant dense<0.000000e+00> : vector<8x128xf32>
    %160 = tpu.matmul %157, %159, %cst_180 {dimension_numbers = #tpu.dot_dimension_numbers<[1], [0], [0], [1], [0, 0, 1, 1], [], []>} : vector<8x8xf32>, vector<8x128xf32>, vector<8x128xf32> -> vector<8x128xf32>
    %161 = arith.addf %155, %160 : vector<8x128xf32>
    %c0_181 = arith.constant 0 : index
    %c15_182 = arith.constant 15 : index
    %c0_183 = arith.constant 0 : index
    %162 = vector.load %arg7[%c0_181, %c15_182, %c0_183] : memref<8x16x24xf32, #tpu.memory_space<vmem>>, vector<8x1x8xf32>
    %163 = vector.shape_cast %162 : vector<8x1x8xf32> to vector<8x8xf32>
    %c15_184 = arith.constant 15 : index
    %c0_185 = arith.constant 0 : index
    %c0_186 = arith.constant 0 : index
    %164 = vector.load %arg4[%c15_184, %c0_185, %c0_186] : memref<16x8x128xf32, #tpu.memory_space<vmem>>, vector<1x8x128xf32>
    %165 = vector.shape_cast %164 : vector<1x8x128xf32> to vector<8x128xf32>
    %cst_187 = arith.constant dense<0.000000e+00> : vector<8x128xf32>
    %166 = tpu.matmul %163, %165, %cst_187 {dimension_numbers = #tpu.dot_dimension_numbers<[1], [0], [0], [1], [0, 0, 1, 1], [], []>} : vector<8x8xf32>, vector<8x128xf32>, vector<8x128xf32> -> vector<8x128xf32>
    %167 = arith.addf %161, %166 : vector<8x128xf32>
    %c0_188 = arith.constant 0 : index
    %c0_189 = arith.constant 0 : index
    %168 = vector.load %arg5[%c0_188, %c0_189] : memref<1x128xf32, #tpu.memory_space<vmem>>, vector<1x128xf32>
    %169 = vector.broadcast %168 : vector<1x128xf32> to vector<8x128xf32>
    %170 = arith.addf %167, %169 : vector<8x128xf32>
    %c0_190 = arith.constant 0 : index
    %c0_191 = arith.constant 0 : index
    %171 = vector.load %arg6[%c0_190, %c0_191] : memref<8x128xf32, #tpu.memory_space<vmem>>, vector<8x128xf32>
    tpu.vector_store %arg6[%c0_190, %c0_191], %170 {strides = array<i32>} : memref<8x128xf32, #tpu.memory_space<vmem>>, vector<8x128xf32>,
    return
  }
  func.func @transform_0(%arg0: i32) -> (i32, i32, i32) {
    %c0_i32 = arith.constant 0 : i32
    %c0_i32_0 = arith.constant 0 : i32
    %c0_i32_1 = arith.constant 0 : i32
    return %arg0, %c0_i32, %c0_i32_0 : i32, i32, i32
  }
  func.func @transform_1(%arg0: i32) -> (i32, i32, i32) {
    %c0_i32 = arith.constant 0 : i32
    %c0_i32_0 = arith.constant 0 : i32
    %c0_i32_1 = arith.constant 0 : i32
    %c0_i32_2 = arith.constant 0 : i32
    return %c0_i32, %c0_i32_0, %c0_i32_1 : i32, i32, i32
  }
  func.func @transform_2(%arg0: i32) -> (i32, i32, i32) {
    %c0_i32 = arith.constant 0 : i32
    %c0_i32_0 = arith.constant 0 : i32
    %c0_i32_1 = arith.constant 0 : i32
    %c0_i32_2 = arith.constant 0 : i32
    return %c0_i32, %c0_i32_0, %c0_i32_1 : i32, i32, i32
  }
  func.func @transform_3(%arg0: i32) -> (i32, i32, i32) {
    %c0_i32 = arith.constant 0 : i32
    %c0_i32_0 = arith.constant 0 : i32
    %c0_i32_1 = arith.constant 0 : i32
    %c0_i32_2 = arith.constant 0 : i32
    return %c0_i32, %c0_i32_0, %c0_i32_1 : i32, i32, i32
  }
  func.func @transform_4(%arg0: i32) -> (i32, i32) {
    %c0_i32 = arith.constant 0 : i32
    %c0_i32_0 = arith.constant 0 : i32
    %c0_i32_1 = arith.constant 0 : i32
    return %c0_i32, %c0_i32_0 : i32, i32
  }
  func.func @transform_5(%arg0: i32) -> (i32, i32) {
    %c0_i32 = arith.constant 0 : i32
    %c0_i32_0 = arith.constant 0 : i32
    return %arg0, %c0_i32 : i32, i32
  }
}

</mosaic_0001>

<bundles_post_ra>
// kernel: tpu_custom_call.1
= control target key start
LH: loop header
LB: loop body
LE: loop exit
PB: predicated region body
PF: predicated region fallthrough
CT: control target
= control target key end

     0   :  { %vm46_vm0 = vcmask 64512   ;;  %vm48_vm1 = vcmask 63488   ;;  %s2372_s20 = smov 8   ;;  %s2373_s21 = smov 16   ;;  %s3694_s0 = inlined_call_operand.vmem [shape: f32[8,16,8], index: 0, kind: input, shape index: {}]   ;;  %s3695_s1 = inlined_call_operand.vmem [shape: f32[3,24,16], index: 1, kind: input, shape index: {}]   ;;  %s3696_s2 = inlined_call_operand.vmem [shape: f32[3,1,16], index: 2, kind: input, shape index: {}]   ;;  %s3697_s3 = inlined_call_operand.vmem [shape: f32[16,8,128], index: 3, kind: input, shape index: {}]   ;;  %s3698_s4 = inlined_call_operand.vmem [shape: f32[1,128], index: 4, kind: input, shape index: {}]   ;;  %s3699_s5 = inlined_call_operand.hbm [shape: f32[8,128], index: 5, kind: output, shape index: {}]  }
   0x1   :  { %v21_v0 = vld [vmem:[%s3694_s0] sm:$0xff]  ;;  %v22_v1 = vld [vmem:[%s3694_s0 + $0x8] sm:$0xff]  ;;  %v23_v2 = vld [vmem:[%s3694_s0 + $0x10] sm:$0xff] }
   0x2   :  { %80 = vrot.lane.b32.xlu0 %v21_v0, %s2372_s20  ;;  %47 = vst.msk [vmem:[#allocation2 + $0x1] sm:$0xff] %vm46_vm0, %v21_v0  ;;  %145 = vrot.lane.b32.xlu1 %v21_v0, %s2373_s21  ;;  %v24_v3 = vld [vmem:[%s3694_s0 + $0x18] sm:$0xff]  ;;  %v26_v4 = vld [vmem:[%s3694_s0 + $0x28] sm:$0xff] }
   0x3   :  { %49 = vst.msk [vmem:[#allocation2 + $0x9] sm:$0x7f] %vm48_vm1, %v22_v1  ;;  %84 = vrot.lane.b32.xlu2 %v23_v2, %s2372_s20  ;;  %v25_v5 = vld [vmem:[%s3694_s0 + $0x20] sm:$0xff] }
   0x4   :  { %51 = vst.msk [vmem:[#allocation2 + $0x19] sm:$0x7f] %vm48_vm1, %v24_v3 }
   0x5   :  { %50 = vst.msk [vmem:[#allocation2 + $0x11] sm:$0xff] %vm46_vm0, %v23_v2 }
   0x6   :  { %53 = vst.msk [vmem:[#allocation2 + $0x29] sm:$0x7f] %vm48_vm1, %v26_v4 }
   0x7   :  { %10 = vsyncpa [#allocation4], 0  ;;  %52 = vst.msk [vmem:[#allocation2 + $0x21] sm:$0xff] %vm46_vm0, %v25_v5  ;;  %v27_v6 = vld [vmem:[%s3694_s0 + $0x30] sm:$0xff]  ;;  %v28_v7 = vld [vmem:[%s3694_s0 + $0x38] sm:$0xff]  ;;  %vm37_vm2 = vcmask 57344  }
   0x8   :  { %54 = vst.msk [vmem:[#allocation2 + $0x31] sm:$0xff] %vm46_vm0, %v27_v6  ;;  %v2374_v8 = vmov 0.0   ;;  %v238_v9 = vld [vmem:[%s3695_s1 + $0x10] sm:$0xff]  ;;  %v29_v10 = vld [vmem:[%s3694_s0 + $0x40] sm:$0xff]  ;;  %v237_v11 = vld [vmem:[%s3695_s1 + $0x8] sm:$0xff]  ;;  %vm128_vm3 = vcmask 130112  }
   0x9   :  { %55 = vst.msk [vmem:[#allocation2 + $0x39] sm:$0x7f] %vm48_vm1, %v28_v7  ;;  %305 = vmatpush.msra.mxu0 %v238_v9  ;;  %v236_v13 = vld [vmem:[%s3695_s1] sm:$0xff]  ;;  %v30_v14 = vld [vmem:[%s3694_s0 + $0x48] sm:$0xff]  ;;  %vm211_vm4 = vcmask 188544   ;;  %vm193_vm5 = vcmask 195713  }
   0xa   :  { %82 = vrot.lane.b32.xlu0 %v22_v1, %s2372_s20  ;;  %147 = vrot.lane.b32.xlu1 %v22_v1, %s2373_s21  ;;  %38 = vst.msk [vmem:[#allocation2] sm:$0x1] %vm37_vm2, %v2374_v8  ;;  %vm195_vm6 = vcmask 195712   ;;  %v32_v21 = vld [vmem:[%s3694_s0 + $0x58] sm:$0xff]  ;;  %v31_v22 = vld [vmem:[%s3694_s0 + $0x50] sm:$0xff]  ;;  %vm243_vm7 = vcmask 195584  }
   0xb   :  { %86 = vrot.lane.b32.xlu2 %v24_v3, %s2372_s20  ;;  %39 = vst.msk [vmem:[#allocation2 + $0x10] sm:$0x1] %vm37_vm2, %v2374_v8  ;;  %306 = vmatpush.msra.mxu0 %v237_v11  ;;  %vm469_vm8 = vcmask 58368   ;;  %v33_v34 = vld [vmem:[%s3694_s0 + $0x60] sm:$0xff]  ;;  %v34_v38 = vld [vmem:[%s3694_s0 + $0x68] sm:$0xff]  ;;  %v36_v41 = vld [vmem:[%s3694_s0 + $0x78] sm:$0xff] }
   0xc   :  { %40 = vst.msk [vmem:[#allocation2 + $0x20] sm:$0x1] %vm37_vm2, %v2374_v8  ;;  %v35_v42 = vld [vmem:[%s3694_s0 + $0x70] sm:$0xff]  ;;  %v2582_v55 = vld [vmem:[%s3696_s2] ss:$0 sm:$0xff]  ;;  %s2375_s11 = smov 120  }
   0xd   :  { %41 = vst.msk [vmem:[#allocation2 + $0x30] sm:$0x1] %vm37_vm2, %v2374_v8  ;;  %307 = vmatpush.msra.mxu0 %v236_v13  ;;  %vm479_vm9 = vcmask 62464   ;;  %vm623_vm10 = vcmask 195714   ;;  %vm640_vm11 = vcmask 189568   ;;  %vm899_vm12 = vcmask 60416  }
   0xe   :  { %42 = vst.msk [vmem:[#allocation2 + $0x40] sm:$0x1] %vm37_vm2, %v2374_v8  ;;  %vm1052_vm13 = vcmask 195716   ;;  %vm1069_vm14 = vcmask 191616   ;;  %vm1372_vm15 = vcmask 1041409   ;;  %s2376_s6 = smov [#allocation3]  }
   0xf   :  { %43 = vst.msk [vmem:[#allocation2 + $0x50] sm:$0x1] %vm37_vm2, %v2374_v8  ;;  %s2239_s7 = sshll.u32 %s2376_s6, 4  ;;  %s2241_s0 = sshll.u32 %s3699_s5, 4  ;;  %s2240_s7 = int_to_ptr.vmem [resolvable:$true] %s2239_s7  ;;  %s2242_s0 = int_to_ptr.hbm [resolvable:$true] %s2241_s0 }
  0x10   :  { %44 = vst.msk [vmem:[#allocation2 + $0x60] sm:$0x1] %vm37_vm2, %v2374_v8 }
  0x11   :  { %45 = vst.msk [vmem:[#allocation2 + $0x70] sm:$0x1] %vm37_vm2, %v2374_v8  ;;  %vm1378_vm2 = vcmask 1043459  }
  0x12   :  { %151 = vrot.lane.b32.xlu1 %v24_v3, %s2373_s21  ;;  %149 = vrot.lane.b32.xlu0 %v23_v2, %s2373_s21  ;;  %56 = vst.msk [vmem:[#allocation2 + $0x41] sm:$0xff] %vm46_vm0, %v29_v10 }
  0x13   :  { %88 = vrot.lane.b32.xlu2 %v25_v5, %s2372_s20  ;;  %57 = vst.msk [vmem:[#allocation2 + $0x49] sm:$0x7f] %vm48_vm1, %v30_v14 }
  0x14   :  { %59 = vst.msk [vmem:[#allocation2 + $0x59] sm:$0x7f] %vm48_vm1, %v32_v21 }
  0x15   :  { %58 = vst.msk [vmem:[#allocation2 + $0x51] sm:$0xff] %vm46_vm0, %v31_v22 }
  0x16   :  { %60 = vst.msk [vmem:[#allocation2 + $0x61] sm:$0xff] %vm46_vm0, %v33_v34 }
  0x17   :  { %61 = vst.msk [vmem:[#allocation2 + $0x69] sm:$0x7f] %vm48_vm1, %v34_v38 }
  0x18   :  { %63 = vst.msk [vmem:[#allocation2 + $0x79] sm:$0x7f] %vm48_vm1, %v36_v41  ;;  %vm1375_vm1 = vcmask 1042434  }
  0x19   :  { %62 = vst.msk [vmem:[#allocation2 + $0x71] sm:$0xff] %vm46_vm0, %v35_v42 }
  0x1a   :  { %90 = vrot.lane.b32.xlu0 %v26_v4, %s2372_s20  ;;  %153 = vrot.lane.b32.xlu1 %v25_v5, %s2373_s21 }
  0x1b   :  { %155 = vrot.lane.b32.xlu2 %v26_v4, %s2373_s21 }
  0x22   :  { %92 = vrot.lane.b32.xlu0 %v27_v6, %s2372_s20  ;;  %94 = vrot.lane.b32.xlu1 %v28_v7, %s2372_s20 }
  0x23   :  { %157 = vrot.lane.b32.xlu2 %v27_v6, %s2373_s21 }
  0x2a   :  { %159 = vrot.lane.b32.xlu0 %v28_v7, %s2373_s21  ;;  %96 = vrot.lane.b32.xlu1 %v29_v10, %s2372_s20 }
  0x2b   :  { %98 = vrot.lane.b32.xlu2 %v30_v14, %s2372_s20 }
  0x32   :  { %161 = vrot.lane.b32.xlu0 %v29_v10, %s2373_s21  ;;  %163 = vrot.lane.b32.xlu1 %v30_v14, %s2373_s21 }
  0x33   :  { %100 = vrot.lane.b32.xlu2 %v31_v22, %s2372_s20 }
  0x3a   :  { %102 = vrot.lane.b32.xlu0 %v32_v21, %s2372_s20  ;;  %165 = vrot.lane.b32.xlu1 %v31_v22, %s2373_s21 }
  0x3b   :  { %167 = vrot.lane.b32.xlu2 %v32_v21, %s2373_s21 }
  0x42   :  { %104 = vrot.lane.b32.xlu0 %v33_v34, %s2372_s20  ;;  %106 = vrot.lane.b32.xlu1 %v34_v38, %s2372_s20 }
  0x43   :  { %169 = vrot.lane.b32.xlu2 %v33_v34, %s2373_s21 }
  0x4a   :  { %171 = vrot.lane.b32.xlu0 %v34_v38, %s2373_s21  ;;  %108 = vrot.lane.b32.xlu1 %v35_v42, %s2372_s20 }
  0x4b   :  { %110 = vrot.lane.b32.xlu2 %v36_v41, %s2372_s20 }
  0x52   :  { %173 = vrot.lane.b32.xlu0 %v35_v42, %s2373_s21  ;;  %175 = vrot.lane.b32.xlu1 %v36_v41, %s2373_s21 }
  0x5d   :  { %v85_v12 = vpop.permute.xlu2 %84 }
  0x5e   :  { %131 = vst.msk [vmem:[#allocation2 + $0x10] sm:$0xff] %vm128_vm3, %v85_v12 }
  0x65   :  { %v87_v15 = vpop.permute.xlu2 %86 }
  0x66   :  { %132 = vst.msk [vmem:[#allocation2 + $0x18] sm:$0xff] %vm128_vm3, %v87_v15 }
  0x67   :  { %213 = vst.msk [vmem:[#allocation2 + $0x1f] sm:$0x1] %vm211_vm4, %v2374_v8 }
  0x6d   :  { %v89_v16 = vpop.permute.xlu2 %88 }
  0x6e   :  { %133 = vst.msk [vmem:[#allocation2 + $0x20] sm:$0xff] %vm128_vm3, %v89_v16 }
  0x74   :  { %v81_v17 = vpop.permute.xlu0 %80  ;;  %v146_v18 = vpop.permute.xlu1 %145 }
  0x75   :  { %129 = vst.msk [vmem:[#allocation2] sm:$0xff] %vm128_vm3, %v81_v17  ;;  %v156_v29 = vpop.permute.xlu2 %155 }
  0x76   :  { %194 = vst.msk [vmem:[#allocation2 - $0x1] sm:$0xfe] %vm193_vm5, %v146_v18 }
  0x7c   :  { %v83_v19 = vpop.permute.xlu0 %82  ;;  %v148_v20 = vpop.permute.xlu1 %147 }
  0x7d   :  { %130 = vst.msk [vmem:[#allocation2 + $0x8] sm:$0xff] %vm128_vm3, %v83_v19  ;;  %v158_v33 = vpop.permute.xlu2 %157 }
  0x7e   :  { %212 = vst.msk [vmem:[#allocation2 + $0xf] sm:$0x1] %vm211_vm4, %v2374_v8 }
  0x7f   :  { %196 = vst.msk [vmem:[#allocation2 + $0x7] sm:$0xff] %vm195_vm6, %v148_v20 }
  0x84   :  { %v152_v23 = vpop.permute.xlu1 %151  ;;  %v150_v24 = vpop.permute.xlu0 %149 }
  0x85   :  { %198 = vst.msk [vmem:[#allocation2 + $0x17] sm:$0xff] %vm195_vm6, %v152_v23  ;;  %v99_v44 = vpop.permute.xlu2 %98 }
  0x86   :  { %v220_v25 = vld [vmem:[#allocation2] sm:$0xff]  ;;  %197 = vst.msk [vmem:[#allocation2 + $0xf] sm:$0xfe] %vm193_vm5, %v150_v24  ;;  %v221_v30 = vld [vmem:[#allocation2 + $0x8] sm:$0xff] }
  0x87   :  { %2250 = vmatmul.msk.f32.vlgmr.msra.gmra.mxu0 %vm243_vm7, %v220_v25  ;;  %470 = vst.msk [vmem:[#allocation2] sm:$0x3] %vm469_vm8, %v2374_v8 }
  0x88   :  { %138 = vst.msk [vmem:[#allocation2 + $0x48] sm:$0xff] %vm128_vm3, %v99_v44 }
  0x89   :  { %216 = vst.msk [vmem:[#allocation2 + $0x4f] sm:$0x1] %vm211_vm4, %v2374_v8 }
  0x8c   :  { %v91_v26 = vpop.permute.xlu0 %90  ;;  %v154_v27 = vpop.permute.xlu1 %153  ;;  %v223_v37 = vld [vmem:[#allocation2 + $0x18] sm:$0xff] }
  0x8d   :  { %v222_v28 = vld [vmem:[#allocation2 + $0x10] sm:$0xff]  ;;  %134 = vst.msk [vmem:[#allocation2 + $0x28] sm:$0xff] %vm128_vm3, %v91_v26  ;;  %v101_v49 = vpop.permute.xlu2 %100 }
  0x8e   :  { %471 = vst.msk [vmem:[#allocation2 + $0x10] sm:$0x3] %vm469_vm8, %v2374_v8 }
  0x8f   :  { %2251 = vmatmul.msk.f32.gmra.mxu0 %vm243_vm7, %v221_v30  ;;  %214 = vst.msk [vmem:[#allocation2 + $0x2f] sm:$0x1] %vm211_vm4, %v2374_v8 }
  0x90   :  { %200 = vst.msk [vmem:[#allocation2 + $0x27] sm:$0xff] %vm195_vm6, %v156_v29 }
  0x91   :  { %199 = vst.msk [vmem:[#allocation2 + $0x1f] sm:$0xfe] %vm193_vm5, %v154_v27 }
  0x92   :  { %139 = vst.msk [vmem:[#allocation2 + $0x50] sm:$0xff] %vm128_vm3, %v101_v49 }
  0x94   :  { %v93_v31 = vpop.permute.xlu0 %92  ;;  %v95_v32 = vpop.permute.xlu1 %94 }
  0x95   :  { %135 = vst.msk [vmem:[#allocation2 + $0x30] sm:$0xff] %vm128_vm3, %v93_v31  ;;  %v168_v52 = vpop.permute.xlu2 %167 }
  0x96   :  { %136 = vst.msk [vmem:[#allocation2 + $0x38] sm:$0xff] %vm128_vm3, %v95_v32 }
  0x97   :  { %2252 = vmatmul.msk.f32.gmra.mxu0 %vm243_vm7, %v222_v28  ;;  %215 = vst.msk [vmem:[#allocation2 + $0x3f] sm:$0x1] %vm211_vm4, %v2374_v8  ;;  %v225_v40 = vld [vmem:[#allocation2 + $0x28] sm:$0xff] }
  0x98   :  { %v224_v35 = vld [vmem:[#allocation2 + $0x20] sm:$0xff]  ;;  %201 = vst.msk [vmem:[#allocation2 + $0x2f] sm:$0xfe] %vm193_vm5, %v158_v33 }
  0x99   :  { %472 = vst.msk [vmem:[#allocation2 + $0x20] sm:$0x3] %vm469_vm8, %v2374_v8 }
  0x9c   :  { %v160_v36 = vpop.permute.xlu0 %159  ;;  %v97_v45 = vpop.permute.xlu1 %96 }
  0x9d   :  { %202 = vst.msk [vmem:[#allocation2 + $0x37] sm:$0xff] %vm195_vm6, %v160_v36  ;;  %v170_v61 = vpop.permute.xlu2 %169 }
  0x9e   :  { %137 = vst.msk [vmem:[#allocation2 + $0x40] sm:$0xff] %vm128_vm3, %v97_v45 }
  0x9f   :  { %2253 = vmatmul.msk.f32.gmra.mxu0 %vm243_vm7, %v223_v37 }
  0xa4   :  { %v226_v39 = vld [vmem:[#allocation2 + $0x30] sm:$0xff]  ;;  %v227_v43 = vld [vmem:[#allocation2 + $0x38] sm:$0xff]  ;;  %v162_v46 = vpop.permute.xlu0 %161  ;;  %v164_v47 = vpop.permute.xlu1 %163 }
  0xa5   :  { %473 = vst.msk [vmem:[#allocation2 + $0x30] sm:$0x3] %vm469_vm8, %v2374_v8  ;;  %v111_v1 = vpop.permute.xlu2 %110 }
  0xa6   :  { %203 = vst.msk [vmem:[#allocation2 + $0x3f] sm:$0xfe] %vm193_vm5, %v162_v46 }
  0xa7   :  { %2254 = vmatmul.msk.f32.gmra.mxu0 %vm243_vm7, %v224_v35  ;;  %204 = vst.msk [vmem:[#allocation2 + $0x47] sm:$0xff] %vm195_vm6, %v164_v47 }
  0xa8   :  { %144 = vst.msk [vmem:[#allocation2 + $0x78] sm:$0xff] %vm128_vm3, %v111_v1 }
  0xa9   :  { %219 = vst.msk [vmem:[#allocation2 + $0x7f] sm:$0x1] %vm211_vm4, %v2374_v8 }
  0xac   :  { %v103_v51 = vpop.permute.xlu0 %102  ;;  %v166_v53 = vpop.permute.xlu1 %165 }
  0xad   :  { %140 = vst.msk [vmem:[#allocation2 + $0x58] sm:$0xff] %vm128_vm3, %v103_v51 }
  0xae   :  { %v228_v48 = vld [vmem:[#allocation2 + $0x40] sm:$0xff]  ;;  %v229_v50 = vld [vmem:[#allocation2 + $0x48] sm:$0xff]  ;;  %217 = vst.msk [vmem:[#allocation2 + $0x5f] sm:$0x1] %vm211_vm4, %v2374_v8 }
  0xaf   :  { %2255 = vmatmul.msk.f32.gmra.mxu0 %vm243_vm7, %v225_v40  ;;  %474 = vst.msk [vmem:[#allocation2 + $0x40] sm:$0x3] %vm469_vm8, %v2374_v8 }
  0xb0   :  { %206 = vst.msk [vmem:[#allocation2 + $0x57] sm:$0xff] %vm195_vm6, %v168_v52 }
  0xb1   :  { %205 = vst.msk [vmem:[#allocation2 + $0x4f] sm:$0xfe] %vm193_vm5, %v166_v53 }
  0xb4   :  { %v105_v62 = vpop.permute.xlu0 %104  ;;  %v107_v9 = vpop.permute.xlu1 %106 }
  0xb5   :  { %141 = vst.msk [vmem:[#allocation2 + $0x60] sm:$0xff] %vm128_vm3, %v105_v62 }
  0xb6   :  { %207 = vst.msk [vmem:[#allocation2 + $0x5f] sm:$0xfe] %vm193_vm5, %v170_v61 }
  0xb7   :  { %2256 = vmatmul.msk.f32.gmra.mxu0 %vm243_vm7, %v226_v39  ;;  %v231_v58 = vld [vmem:[#allocation2 + $0x58] sm:$0xff]  ;;  %142 = vst.msk [vmem:[#allocation2 + $0x68] sm:$0xff] %vm128_vm3, %v107_v9 }
  0xb8   :  { %v230_v54 = vld [vmem:[#allocation2 + $0x50] sm:$0xff]  ;;  %218 = vst.msk [vmem:[#allocation2 + $0x6f] sm:$0x1] %vm211_vm4, %v2374_v8  ;;  %vm1384_vm4 = vcmask 1045509  }
  0xb9   :  { %475 = vst.msk [vmem:[#allocation2 + $0x50] sm:$0x3] %vm469_vm8, %v2374_v8 }
  0xbc   :  { %v172_v10 = vpop.permute.xlu0 %171  ;;  %v109_v12 = vpop.permute.xlu1 %108 }
  0xbd   :  { %208 = vst.msk [vmem:[#allocation2 + $0x67] sm:$0xff] %vm195_vm6, %v172_v10 }
  0xbe   :  { %143 = vst.msk [vmem:[#allocation2 + $0x70] sm:$0xff] %vm128_vm3, %v109_v12 }
  0xbf   :  { %2257 = vmatmul.msk.f32.gmra.mxu0 %vm243_vm7, %v227_v43 }
  0xc4   :  { %v232_v11 = vld [vmem:[#allocation2 + $0x60] sm:$0xff]  ;;  %v174_v13 = vpop.permute.xlu0 %173  ;;  %v176_v14 = vpop.permute.xlu1 %175  ;;  %v233_v15 = vld [vmem:[#allocation2 + $0x68] sm:$0xff] }
  0xc5   :  { %476 = vst.msk [vmem:[#allocation2 + $0x60] sm:$0x3] %vm469_vm8, %v2374_v8 }
  0xc6   :  { %209 = vst.msk [vmem:[#allocation2 + $0x6f] sm:$0xfe] %vm193_vm5, %v174_v13  ;;  %vm1387_vm5 = vcmask 1046534  }
  0xc7   :  { %2258 = vmatmul.msk.f32.gmra.mxu0 %vm243_vm7, %v228_v48  ;;  %210 = vst.msk [vmem:[#allocation2 + $0x77] sm:$0xff] %vm195_vm6, %v176_v14 }
  0xce   :  { %v234_v19 = vld [vmem:[#allocation2 + $0x70] sm:$0xff]  ;;  %v235_v23 = vld [vmem:[#allocation2 + $0x78] sm:$0xff] }
  0xcf   :  { %2259 = vmatmul.msk.f32.gmra.mxu0 %vm243_vm7, %v229_v50  ;;  %477 = vst.msk [vmem:[#allocation2 + $0x70] sm:$0x3] %vm469_vm8, %v2374_v8 }
  0xd7   :  { %2260 = vmatmul.msk.f32.gmra.mxu0 %vm243_vm7, %v230_v54 }
  0xdf   :  { %2261 = vmatmul.msk.f32.gmra.mxu0 %vm243_vm7, %v231_v58  ;;  %v2267_v58 = vld [vmem:[%s3695_s1 + $0x20] sm:$0xff] }
  0xe7   :  { %2262 = vmatmul.msk.f32.gmra.mxu0 %vm243_vm7, %v232_v11 }
  0xef   :  { %2263 = vmatmul.msk.f32.gmra.mxu0 %vm243_vm7, %v233_v15 }
  0xf7   :  { %2264 = vmatmul.msk.f32.gmra.mxu0 %vm243_vm7, %v234_v19 }
  0xff   :  { %2265 = vmatmul.msk.f32.gmra.mxu0 %vm243_vm7, %v235_v23 }
 0x104   :  { %v309_v56 = vpop.f32.mrf.mxu0 }
 0x105   :  { %v310_v57 = vadd.f32 %v2582_v55, %v309_v56 }
 0x107   :  { %389 = vrot.lane.b32.xlu2 %v310_v57, %s2375_s11  ;;  %v357_v17 = vmax.f32 %v310_v57, 0.0  ;;  %v2268_v57 = vld [vmem:[%s3695_s1 + $0x28] sm:$0xff] }
 0x108   :  { %735 = vmatpush.msra.mxu1 %v2268_v57 }
 0x10a   :  { %736 = vmatpush.msra.mxu1 %v2267_v58 }
 0x10c   :  { %v312_v59 = vpop.f32.mrf.mxu0 }
 0x10d   :  { %v313_v60 = vadd.f32 %v2582_v55, %v312_v59 }
 0x10f   :  { %391 = vrot.lane.b32.xlu0 %v313_v60, %s2375_s11  ;;  %v358_v29 = vmax.f32 %v313_v60, 0.0 }
 0x114   :  { %v315_v63 = vpop.f32.mrf.mxu0 }
 0x115   :  { %v2592_v0 = vadd.f32 %v2582_v55, %v315_v63 }
 0x117   :  { %393 = vrot.lane.b32.xlu1 %v2592_v0, %s2375_s11  ;;  %v359_v34 = vmax.f32 %v2592_v0, 0.0  ;;  %v2266_v0 = vld [vmem:[%s3695_s1 + $0x18] sm:$0xff] }
 0x118   :  { %737 = vmatpush.msra.mxu1 %v2266_v0 }
 0x11c   :  { %v318_v2 = vpop.f32.mrf.mxu0 }
 0x11d   :  { %v319_v3 = vadd.f32 %v2582_v55, %v318_v2 }
 0x11f   :  { %395 = vrot.lane.b32.xlu2 %v319_v3, %s2375_s11  ;;  %v360_v25 = vmax.f32 %v319_v3, 0.0 }
 0x124   :  { %v321_v4 = vpop.f32.mrf.mxu0 }
 0x125   :  { %v2602_v5 = vadd.f32 %v2582_v55, %v321_v4 }
 0x127   :  { %397 = vrot.lane.b32.xlu0 %v2602_v5, %s2375_s11  ;;  %v361_v42 = vmax.f32 %v2602_v5, 0.0 }
 0x12c   :  { %v324_v6 = vpop.f32.mrf.mxu0 }
 0x12d   :  { %v2607_v7 = vadd.f32 %v2582_v55, %v324_v6 }
 0x12f   :  { %399 = vrot.lane.b32.xlu1 %v2607_v7, %s2375_s11  ;;  %v362_v48 = vmax.f32 %v2607_v7, 0.0 }
 0x134   :  { %v327_v16 = vpop.f32.mrf.mxu0 }
 0x135   :  { %v2640_v37 = vadd.f32 %v2582_v55, %v327_v16 }
 0x137   :  { %v363_v7 = vmax.f32 %v2640_v37, 0.0 }
 0x13c   :  { %v330_v22 = vpop.f32.mrf.mxu0 }
 0x13d   :  { %v2629_v24 = vadd.f32 %v2582_v55, %v330_v22 }
 0x13f   :  { %v364_v59 = vmax.f32 %v2629_v24, 0.0 }
 0x144   :  { %v333_v32 = vpop.f32.mrf.mxu0 }
 0x145   :  { %v2656_v45 = vadd.f32 %v2582_v55, %v333_v32 }
 0x147   :  { %v365_v23 = vmax.f32 %v2656_v45, 0.0 }
 0x14c   :  { %v336_v39 = vpop.f32.mrf.mxu0 }
 0x14d   :  { %v2648_v40 = vadd.f32 %v2582_v55, %v336_v39 }
 0x14f   :  { %v366_v15 = vmax.f32 %v2648_v40, 0.0 }
 0x154   :  { %v339_v41 = vpop.f32.mrf.mxu0 }
 0x155   :  { %v2673_v53 = vadd.f32 %v2582_v55, %v339_v41 }
 0x157   :  { %v367_v39 = vmax.f32 %v2673_v53, 0.0 }
 0x15c   :  { %v342_v47 = vpop.f32.mrf.mxu0 }
 0x15d   :  { %v2665_v51 = vadd.f32 %v2582_v55, %v342_v47 }
 0x161   :  { %v390_v18 = vpop.permute.xlu2 %389 }
 0x162   :  { %v437_v20 = vadd.f32 %v390_v18, %v357_v17 }
 0x164   :  { %v453_v21 = vmax.f32 %v437_v20, 0.0  ;;  %v345_v1 = vpop.f32.mrf.mxu0 }
 0x165   :  { %v2692_v3 = vadd.f32 %v2582_v55, %v345_v1 }
 0x166   :  { %478 = vst.msk [vmem:[#allocation2 + $0x2] sm:$0xff] %vm46_vm0, %v453_v21  ;;  %575 = vrot.lane.b32.xlu1 %v453_v21, %s2373_s21  ;;  %511 = vrot.lane.b32.xlu2 %v453_v21, %s2372_s20 }
 0x16c   :  { %v348_v13 = vpop.f32.mrf.mxu0 }
 0x16d   :  { %v2715_v20 = vadd.f32 %v2582_v55, %v348_v13  ;;  %v2795_v13 = vld [vmem:[%s3696_s2 + $0x1] ss:$0 sm:$0xff] }
 0x16e   :  { %403 = vrot.lane.b32.xlu1 %v2629_v24, %s2375_s11 }
 0x174   :  { %v351_v22 = vpop.f32.mrf.mxu0 }
 0x179   :  { %v396_v26 = vpop.permute.xlu2 %395 }
 0x17a   :  { %v440_v27 = vadd.f32 %v396_v26, %v360_v25 }
 0x17c   :  { %v456_v28 = vmax.f32 %v440_v27, 0.0 }
 0x17e   :  { %482 = vst.msk [vmem:[#allocation2 + $0x1a] sm:$0x3f] %vm479_vm9, %v456_v28 }
 0x181   :  { %v392_v30 = vpop.permute.xlu0 %391 }
 0x182   :  { %v438_v31 = vadd.f32 %v392_v30, %v358_v29  ;;  %v354_v30 = vpop.f32.mrf.mxu0 }
 0x184   :  { %v454_v33 = vmax.f32 %v438_v31, 0.0  ;;  %v368_v31 = vmax.f32 %v2665_v51, 0.0 }
 0x186   :  { %513 = vrot.lane.b32.xlu0 %v454_v33, %s2372_s20  ;;  %577 = vrot.lane.b32.xlu2 %v454_v33, %s2373_s21  ;;  %480 = vst.msk [vmem:[#allocation2 + $0xa] sm:$0x3f] %vm479_vm9, %v454_v33 }
 0x189   :  { %v394_v35 = vpop.permute.xlu1 %393 }
 0x18a   :  { %v439_v36 = vadd.f32 %v394_v35, %v359_v34 }
 0x18c   :  { %v455_v38 = vmax.f32 %v439_v36, 0.0 }
 0x18e   :  { %481 = vst.msk [vmem:[#allocation2 + $0x12] sm:$0xff] %vm46_vm0, %v455_v38  ;;  %401 = vrot.lane.b32.xlu0 %v2640_v37, %s2375_s11  ;;  %579 = vrot.lane.b32.xlu1 %v455_v38, %s2373_s21  ;;  %v2742_v37 = vadd.f32 %v2582_v55, %v354_v30 }
 0x18f   :  { %515 = vrot.lane.b32.xlu2 %v455_v38, %s2372_s20 }
 0x196   :  { %517 = vrot.lane.b32.xlu0 %v456_v28, %s2372_s20  ;;  %407 = vrot.lane.b32.xlu1 %v2648_v40, %s2375_s11 }
 0x197   :  { %581 = vrot.lane.b32.xlu2 %v456_v28, %s2373_s21  ;;  %v2730_v28 = vadd.f32 %v2582_v55, %v351_v22 }
 0x199   :  { %v398_v43 = vpop.permute.xlu0 %397 }
 0x19a   :  { %v441_v44 = vadd.f32 %v398_v43, %v361_v42 }
 0x19c   :  { %v457_v46 = vmax.f32 %v441_v44, 0.0 }
 0x19e   :  { %483 = vst.msk [vmem:[#allocation2 + $0x22] sm:$0xff] %vm46_vm0, %v457_v46  ;;  %405 = vrot.lane.b32.xlu0 %v2656_v45, %s2375_s11  ;;  %583 = vrot.lane.b32.xlu1 %v457_v46, %s2373_s21  ;;  %v369_v45 = vmax.f32 %v2692_v3, 0.0 }
 0x19f   :  { %519 = vrot.lane.b32.xlu2 %v457_v46, %s2372_s20 }
 0x1a1   :  { %v400_v49 = vpop.permute.xlu1 %399 }
 0x1a2   :  { %v442_v50 = vadd.f32 %v400_v49, %v362_v48 }
 0x1a4   :  { %v458_v52 = vmax.f32 %v442_v50, 0.0 }
 0x1a6   :  { %521 = vrot.lane.b32.xlu0 %v458_v52, %s2372_s20  ;;  %411 = vrot.lane.b32.xlu1 %v2665_v51, %s2375_s11  ;;  %484 = vst.msk [vmem:[#allocation2 + $0x2a] sm:$0x3f] %vm479_vm9, %v458_v52 }
 0x1a7   :  { %585 = vrot.lane.b32.xlu2 %v458_v52, %s2373_s21 }
 0x1ae   :  { %409 = vrot.lane.b32.xlu0 %v2673_v53, %s2375_s11 }
 0x1c0   :  { %v512_v54 = vpop.permute.xlu2 %511 }
 0x1c1   :  { %559 = vst.msk [vmem:[#allocation2] sm:$0xff] %vm128_vm3, %v512_v54  ;;  %v370_v54 = vmax.f32 %v2715_v20, 0.0 }
 0x1d8   :  { %v576_v56 = vpop.permute.xlu1 %575 }
 0x1d9   :  { %624 = vst.msk [vmem:[#allocation2 - $0x2] sm:$0xfc] %vm623_vm10, %v576_v56 }
 0x1e0   :  { %v404_v60 = vpop.permute.xlu1 %403  ;;  %v578_v61 = vpop.permute.xlu2 %577 }
 0x1e1   :  { %v444_v62 = vadd.f32 %v404_v60, %v364_v59 }
 0x1e3   :  { %v460_v63 = vmax.f32 %v444_v62, 0.0 }
 0x1e5   :  { %525 = vrot.lane.b32.xlu0 %v460_v63, %s2372_s20  ;;  %486 = vst.msk [vmem:[#allocation2 + $0x3a] sm:$0x3f] %vm479_vm9, %v460_v63 }
 0x1e9   :  { %v516_v2 = vpop.permute.xlu2 %515 }
 0x1ea   :  { %561 = vst.msk [vmem:[#allocation2 + $0x10] sm:$0xff] %vm128_vm3, %v516_v2 }
 0x1ed   :  { %413 = vrot.lane.b32.xlu0 %v2692_v3, %s2375_s11 }
 0x1f1   :  { %v582_v4 = vpop.permute.xlu2 %581 }
 0x1f8   :  { %v514_v5 = vpop.permute.xlu0 %513 }
 0x1f9   :  { %560 = vst.msk [vmem:[#allocation2 + $0x8] sm:$0xff] %vm128_vm3, %v514_v5  ;;  %v520_v6 = vpop.permute.xlu2 %519 }
 0x1fa   :  { %625 = vst.msk [vmem:[#allocation2 + $0x6] sm:$0xff] %vm195_vm6, %v578_v61 }
 0x1fb   :  { %641 = vst.msk [vmem:[#allocation2 + $0xe] sm:$0x3] %vm640_vm11, %v2374_v8 }
 0x1fc   :  { %563 = vst.msk [vmem:[#allocation2 + $0x20] sm:$0xff] %vm128_vm3, %v520_v6  ;;  %v372_v6 = vmax.f32 %v2742_v37, 0.0 }
 0x200   :  { %v402_v9 = vpop.permute.xlu0 %401  ;;  %v580_v10 = vpop.permute.xlu1 %579 }
 0x201   :  { %v443_v11 = vadd.f32 %v402_v9, %v363_v7  ;;  %626 = vst.msk [vmem:[#allocation2 + $0xe] sm:$0xfc] %vm623_vm10, %v580_v10  ;;  %v649_v12 = vld [vmem:[#allocation2] sm:$0xff]  ;;  %v586_v34 = vpop.permute.xlu2 %585 }
 0x202   :  { %2270 = vmatmul.msk.f32.vlgmr.msra.gmra.mxu1 %vm243_vm7, %v649_v12  ;;  %900 = vst.msk [vmem:[#allocation2] sm:$0xf] %vm899_vm12, %v2374_v8  ;;  %v650_v19 = vld [vmem:[#allocation2 + $0x8] sm:$0xff] }
 0x203   :  { %v459_v14 = vmax.f32 %v443_v11, 0.0 }
 0x205   :  { %485 = vst.msk [vmem:[#allocation2 + $0x32] sm:$0xff] %vm46_vm0, %v459_v14  ;;  %587 = vrot.lane.b32.xlu1 %v459_v14, %s2373_s21  ;;  %523 = vrot.lane.b32.xlu2 %v459_v14, %s2372_s20 }
 0x208   :  { %v518_v16 = vpop.permute.xlu0 %517  ;;  %v408_v17 = vpop.permute.xlu1 %407 }
 0x209   :  { %562 = vst.msk [vmem:[#allocation2 + $0x18] sm:$0xff] %vm128_vm3, %v518_v16  ;;  %v446_v18 = vadd.f32 %v408_v17, %v366_v15 }
 0x20a   :  { %627 = vst.msk [vmem:[#allocation2 + $0x16] sm:$0xff] %vm195_vm6, %v582_v4  ;;  %2271 = vmatmul.msk.f32.gmra.mxu1 %vm243_vm7, %v650_v19 }
 0x20b   :  { %642 = vst.msk [vmem:[#allocation2 + $0x1e] sm:$0x3] %vm640_vm11, %v2374_v8  ;;  %v462_v21 = vmax.f32 %v446_v18, 0.0 }
 0x20d   :  { %488 = vst.msk [vmem:[#allocation2 + $0x4a] sm:$0x3f] %vm479_vm9, %v462_v21  ;;  %415 = vrot.lane.b32.xlu1 %v2715_v20, %s2375_s11  ;;  %529 = vrot.lane.b32.xlu0 %v462_v21, %s2372_s20 }
 0x20e   :  { %589 = vrot.lane.b32.xlu2 %v460_v63, %s2373_s21  ;;  %v371_v63 = vmax.f32 %v2730_v28, 0.0 }
 0x210   :  { %v406_v24 = vpop.permute.xlu0 %405  ;;  %v584_v25 = vpop.permute.xlu1 %583 }
 0x211   :  { %v445_v26 = vadd.f32 %v406_v24, %v365_v23  ;;  %628 = vst.msk [vmem:[#allocation2 + $0x1e] sm:$0xfc] %vm623_vm10, %v584_v25  ;;  %v651_v27 = vld [vmem:[#allocation2 + $0x10] sm:$0xff] }
 0x212   :  { %2272 = vmatmul.msk.f32.gmra.mxu1 %vm243_vm7, %v651_v27  ;;  %901 = vst.msk [vmem:[#allocation2 + $0x10] sm:$0xf] %vm899_vm12, %v2374_v8  ;;  %v652_v36 = vld [vmem:[#allocation2 + $0x18] sm:$0xff] }
 0x213   :  { %v461_v29 = vmax.f32 %v445_v26, 0.0 }
 0x215   :  { %487 = vst.msk [vmem:[#allocation2 + $0x42] sm:$0xff] %vm46_vm0, %v461_v29  ;;  %591 = vrot.lane.b32.xlu1 %v461_v29, %s2373_s21  ;;  %417 = vrot.lane.b32.xlu0 %v2730_v28, %s2375_s11 }
 0x216   :  { %527 = vrot.lane.b32.xlu2 %v461_v29, %s2372_s20 }
 0x218   :  { %v522_v32 = vpop.permute.xlu0 %521  ;;  %v412_v33 = vpop.permute.xlu1 %411 }
 0x219   :  { %564 = vst.msk [vmem:[#allocation2 + $0x28] sm:$0xff] %vm128_vm3, %v522_v32  ;;  %v448_v35 = vadd.f32 %v412_v33, %v368_v31 }
 0x21a   :  { %629 = vst.msk [vmem:[#allocation2 + $0x26] sm:$0xff] %vm195_vm6, %v586_v34  ;;  %2273 = vmatmul.msk.f32.gmra.mxu1 %vm243_vm7, %v652_v36 }
 0x21b   :  { %643 = vst.msk [vmem:[#allocation2 + $0x2e] sm:$0x3] %vm640_vm11, %v2374_v8  ;;  %v464_v38 = vmax.f32 %v448_v35, 0.0 }
 0x21d   :  { %490 = vst.msk [vmem:[#allocation2 + $0x5a] sm:$0x3f] %vm479_vm9, %v464_v38  ;;  %419 = vrot.lane.b32.xlu1 %v2742_v37, %s2375_s11  ;;  %533 = vrot.lane.b32.xlu0 %v464_v38, %s2372_s20 }
 0x21e   :  { %593 = vrot.lane.b32.xlu2 %v462_v21, %s2373_s21 }
 0x220   :  { %v410_v40 = vpop.permute.xlu0 %409 }
 0x221   :  { %v447_v41 = vadd.f32 %v410_v40, %v367_v39  ;;  %v653_v42 = vld [vmem:[#allocation2 + $0x20] sm:$0xff] }
 0x222   :  { %2274 = vmatmul.msk.f32.gmra.mxu1 %vm243_vm7, %v653_v42  ;;  %902 = vst.msk [vmem:[#allocation2 + $0x20] sm:$0xf] %vm899_vm12, %v2374_v8  ;;  %v654_v43 = vld [vmem:[#allocation2 + $0x28] sm:$0xff] }
 0x223   :  { %v463_v55 = vmax.f32 %v447_v41, 0.0 }
 0x225   :  { %489 = vst.msk [vmem:[#allocation2 + $0x52] sm:$0xff] %vm46_vm0, %v463_v55  ;;  %595 = vrot.lane.b32.xlu1 %v463_v55, %s2373_s21 }
 0x226   :  { %531 = vrot.lane.b32.xlu2 %v463_v55, %s2372_s20 }
 0x22a   :  { %2275 = vmatmul.msk.f32.gmra.mxu1 %vm243_vm7, %v654_v43 }
 0x22e   :  { %597 = vrot.lane.b32.xlu2 %v464_v38, %s2373_s21 }
 0x257   :  { %v526_v44 = vpop.permute.xlu0 %525 }
 0x258   :  { %566 = vst.msk [vmem:[#allocation2 + $0x38] sm:$0xff] %vm128_vm3, %v526_v44 }
 0x259   :  { %644 = vst.msk [vmem:[#allocation2 + $0x3e] sm:$0x3] %vm640_vm11, %v2374_v8 }
 0x25f   :  { %v414_v46 = vpop.permute.xlu0 %413  ;;  %v524_v47 = vpop.permute.xlu2 %523 }
 0x260   :  { %v449_v48 = vadd.f32 %v414_v46, %v369_v45  ;;  %565 = vst.msk [vmem:[#allocation2 + $0x30] sm:$0xff] %vm128_vm3, %v524_v47 }
 0x262   :  { %v465_v49 = vmax.f32 %v449_v48, 0.0 }
 0x264   :  { %491 = vst.msk [vmem:[#allocation2 + $0x62] sm:$0xff] %vm46_vm0, %v465_v49  ;;  %535 = vrot.lane.b32.xlu0 %v465_v49, %s2372_s20  ;;  %599 = vrot.lane.b32.xlu2 %v465_v49, %s2373_s21 }
 0x268   :  { %v590_v50 = vpop.permute.xlu2 %589 }
 0x269   :  { %631 = vst.msk [vmem:[#allocation2 + $0x36] sm:$0xff] %vm195_vm6, %v590_v50 }
 0x270   :  { %v528_v51 = vpop.permute.xlu2 %527  ;;  %v656_v2 = vld [vmem:[#allocation2 + $0x38] sm:$0xff] }
 0x271   :  { %567 = vst.msk [vmem:[#allocation2 + $0x40] sm:$0xff] %vm128_vm3, %v528_v51 }
 0x277   :  { %v588_v52 = vpop.permute.xlu1 %587 }
 0x278   :  { %630 = vst.msk [vmem:[#allocation2 + $0x2e] sm:$0xfc] %vm623_vm10, %v588_v52  ;;  %v594_v53 = vpop.permute.xlu2 %593 }
 0x27f   :  { %v530_v56 = vpop.permute.xlu0 %529  ;;  %v416_v57 = vpop.permute.xlu1 %415  ;;  %v655_v58 = vld [vmem:[#allocation2 + $0x30] sm:$0xff] }
 0x280   :  { %568 = vst.msk [vmem:[#allocation2 + $0x48] sm:$0xff] %vm128_vm3, %v530_v56  ;;  %v450_v59 = vadd.f32 %v416_v57, %v370_v54  ;;  %v532_v60 = vpop.permute.xlu2 %531  ;;  %v739_v61 = vpop.f32.mrf.mxu1  ;;  %2276 = vmatmul.msk.f32.gmra.mxu1 %vm243_vm7, %v655_v58 }
 0x281   :  { %645 = vst.msk [vmem:[#allocation2 + $0x4e] sm:$0x3] %vm640_vm11, %v2374_v8  ;;  %v740_v20 = vadd.f32 %v2795_v13, %v739_v61 }
 0x282   :  { %633 = vst.msk [vmem:[#allocation2 + $0x46] sm:$0xff] %vm195_vm6, %v594_v53  ;;  %v466_v62 = vmax.f32 %v450_v59, 0.0 }
 0x283   :  { %569 = vst.msk [vmem:[#allocation2 + $0x50] sm:$0xff] %vm128_vm3, %v532_v60  ;;  %v787_v34 = vmax.f32 %v740_v20, 0.0 }
 0x284   :  { %492 = vst.msk [vmem:[#allocation2 + $0x6a] sm:$0x3f] %vm479_vm9, %v466_v62  ;;  %601 = vrot.lane.b32.xlu0 %v466_v62, %s2373_s21  ;;  %537 = vrot.lane.b32.xlu1 %v466_v62, %s2372_s20 }
 0x285   :  { %903 = vst.msk [vmem:[#allocation2 + $0x30] sm:$0xf] %vm899_vm12, %v2374_v8 }
 0x287   :  { %v418_v0 = vpop.permute.xlu0 %417  ;;  %v592_v1 = vpop.permute.xlu1 %591 }
 0x288   :  { %v451_v3 = vadd.f32 %v418_v0, %v371_v63  ;;  %632 = vst.msk [vmem:[#allocation2 + $0x3e] sm:$0xfc] %vm623_vm10, %v592_v1  ;;  %v742_v4 = vpop.f32.mrf.mxu1  ;;  %2277 = vmatmul.msk.f32.gmra.mxu1 %vm243_vm7, %v656_v2  ;;  %v598_v14 = vpop.permute.xlu2 %597 }
 0x289   :  { %v2801_v16 = vadd.f32 %v2795_v13, %v742_v4  ;;  %v658_v18 = vld [vmem:[#allocation2 + $0x48] sm:$0xff] }
 0x28a   :  { %v467_v5 = vmax.f32 %v451_v3, 0.0 }
 0x28b   :  { %v788_v48 = vmax.f32 %v2801_v16, 0.0 }
 0x28c   :  { %493 = vst.msk [vmem:[#allocation2 + $0x72] sm:$0xff] %vm46_vm0, %v467_v5  ;;  %603 = vrot.lane.b32.xlu0 %v467_v5, %s2373_s21  ;;  %539 = vrot.lane.b32.xlu1 %v467_v5, %s2372_s20 }
 0x28f   :  { %v534_v7 = vpop.permute.xlu0 %533  ;;  %v420_v9 = vpop.permute.xlu1 %419  ;;  %v657_v10 = vld [vmem:[#allocation2 + $0x40] sm:$0xff] }
 0x290   :  { %570 = vst.msk [vmem:[#allocation2 + $0x58] sm:$0xff] %vm128_vm3, %v534_v7  ;;  %v452_v11 = vadd.f32 %v420_v9, %v372_v6  ;;  %v745_v12 = vpop.f32.mrf.mxu1  ;;  %2278 = vmatmul.msk.f32.gmra.mxu1 %vm243_vm7, %v657_v10 }
 0x291   :  { %646 = vst.msk [vmem:[#allocation2 + $0x5e] sm:$0x3] %vm640_vm11, %v2374_v8  ;;  %v2814_v21 = vadd.f32 %v2795_v13, %v745_v12 }
 0x292   :  { %635 = vst.msk [vmem:[#allocation2 + $0x56] sm:$0xff] %vm195_vm6, %v598_v14  ;;  %v468_v15 = vmax.f32 %v452_v11, 0.0 }
 0x293   :  { %904 = vst.msk [vmem:[#allocation2 + $0x40] sm:$0xf] %vm899_vm12, %v2374_v8  ;;  %v789_v54 = vmax.f32 %v2814_v21, 0.0 }
 0x294   :  { %494 = vst.msk [vmem:[#allocation2 + $0x7a] sm:$0x3f] %vm479_vm9, %v468_v15  ;;  %605 = vrot.lane.b32.xlu1 %v468_v15, %s2373_s21  ;;  %541 = vrot.lane.b32.xlu2 %v468_v15, %s2372_s20 }
 0x295   :  { %821 = vrot.lane.b32.xlu0 %v2801_v16, %s2375_s11  ;;  %v2288_v16 = vld [vmem:[%s3695_s1 + $0x40] sm:$0xff] }
 0x296   :  { %1164 = vmatpush.msra.mxu2 %v2288_v16 }
 0x297   :  { %v596_v17 = vpop.permute.xlu1 %595 }
 0x298   :  { %634 = vst.msk [vmem:[#allocation2 + $0x4e] sm:$0xfc] %vm623_vm10, %v596_v17  ;;  %v748_v19 = vpop.f32.mrf.mxu1  ;;  %2279 = vmatmul.msk.f32.gmra.mxu1 %vm243_vm7, %v658_v18  ;;  %v2287_v17 = vld [vmem:[%s3695_s1 + $0x38] sm:$0xff] }
 0x299   :  { %v749_v25 = vadd.f32 %v2795_v13, %v748_v19  ;;  %v660_v26 = vld [vmem:[#allocation2 + $0x58] sm:$0xff]  ;;  %1165 = vmatpush.msra.mxu2 %v2287_v17  ;;  %v2286_v19 = vld [vmem:[%s3695_s1 + $0x30] sm:$0xff] }
 0x29b   :  { %v790_v41 = vmax.f32 %v749_v25, 0.0  ;;  %1166 = vmatpush.msra.mxu2 %v2286_v19 }
 0x29c   :  { %823 = vrot.lane.b32.xlu1 %v2814_v21, %s2375_s11  ;;  %819 = vrot.lane.b32.xlu2 %v740_v20, %s2375_s11 }
 0x29f   :  { %v659_v22 = vld [vmem:[#allocation2 + $0x50] sm:$0xff] }
 0x2a0   :  { %v751_v23 = vpop.f32.mrf.mxu1  ;;  %2280 = vmatmul.msk.f32.gmra.mxu1 %vm243_vm7, %v659_v22  ;;  %905 = vst.msk [vmem:[#allocation2 + $0x50] sm:$0xf] %vm899_vm12, %v2374_v8 }
 0x2a1   :  { %v2823_v24 = vadd.f32 %v2795_v13, %v751_v23 }
 0x2a3   :  { %827 = vrot.lane.b32.xlu0 %v2823_v24, %s2375_s11  ;;  %v791_v61 = vmax.f32 %v2823_v24, 0.0 }
 0x2a4   :  { %825 = vrot.lane.b32.xlu2 %v749_v25, %s2375_s11 }
 0x2a8   :  { %v754_v27 = vpop.f32.mrf.mxu1  ;;  %2281 = vmatmul.msk.f32.gmra.mxu1 %vm243_vm7, %v660_v26 }
 0x2a9   :  { %v2831_v28 = vadd.f32 %v2795_v13, %v754_v27 }
 0x2ab   :  { %829 = vrot.lane.b32.xlu1 %v2831_v28, %s2375_s11  ;;  %v792_v4 = vmax.f32 %v2831_v28, 0.0 }
 0x2be   :  { %v600_v30 = vpop.permute.xlu2 %599 }
 0x2d6   :  { %v536_v29 = vpop.permute.xlu0 %535 }
 0x2d7   :  { %571 = vst.msk [vmem:[#allocation2 + $0x60] sm:$0xff] %vm128_vm3, %v536_v29 }
 0x2d8   :  { %636 = vst.msk [vmem:[#allocation2 + $0x5e] sm:$0xfc] %vm623_vm10, %v600_v30 }
 0x2ee   :  { %v542_v31 = vpop.permute.xlu2 %541 }
 0x2ef   :  { %574 = vst.msk [vmem:[#allocation2 + $0x78] sm:$0xff] %vm128_vm3, %v542_v31 }
 0x2f0   :  { %648 = vst.msk [vmem:[#allocation2 + $0x7e] sm:$0x3] %vm640_vm11, %v2374_v8 }
 0x2f6   :  { %v602_v32 = vpop.permute.xlu0 %601  ;;  %v538_v33 = vpop.permute.xlu1 %537 }
 0x2f7   :  { %572 = vst.msk [vmem:[#allocation2 + $0x68] sm:$0xff] %vm128_vm3, %v538_v33  ;;  %v820_v35 = vpop.permute.xlu2 %819 }
 0x2f8   :  { %637 = vst.msk [vmem:[#allocation2 + $0x66] sm:$0xff] %vm195_vm6, %v602_v32  ;;  %v867_v36 = vadd.f32 %v820_v35, %v787_v34 }
 0x2f9   :  { %647 = vst.msk [vmem:[#allocation2 + $0x6e] sm:$0x3] %vm640_vm11, %v2374_v8 }
 0x2fa   :  { %v883_v37 = vmax.f32 %v867_v36, 0.0 }
 0x2fc   :  { %908 = vst.msk [vmem:[#allocation2 + $0x4] sm:$0xff] %vm46_vm0, %v883_v37  ;;  %1004 = vrot.lane.b32.xlu1 %v883_v37, %s2373_s21  ;;  %940 = vrot.lane.b32.xlu2 %v883_v37, %s2372_s20 }
 0x2fd   :  { %v757_v38 = vpop.f32.mrf.mxu1 }
 0x2fe   :  { %v604_v39 = vpop.permute.xlu0 %603  ;;  %v540_v40 = vpop.permute.xlu1 %539  ;;  %v2869_v60 = vadd.f32 %v2795_v13, %v757_v38 }
 0x2ff   :  { %573 = vst.msk [vmem:[#allocation2 + $0x70] sm:$0xff] %vm128_vm3, %v540_v40  ;;  %v826_v42 = vpop.permute.xlu2 %825  ;;  %v661_v55 = vld [vmem:[#allocation2 + $0x60] sm:$0xff] }
 0x300   :  { %638 = vst.msk [vmem:[#allocation2 + $0x6e] sm:$0xfc] %vm623_vm10, %v604_v39  ;;  %v870_v43 = vadd.f32 %v826_v42, %v790_v41  ;;  %2282 = vmatmul.msk.f32.gmra.mxu1 %vm243_vm7, %v661_v55  ;;  %v662_v50 = vld [vmem:[#allocation2 + $0x68] sm:$0xff]  ;;  %v793_v31 = vmax.f32 %v2869_v60, 0.0 }
 0x301   :  { %906 = vst.msk [vmem:[#allocation2 + $0x60] sm:$0xf] %vm899_vm12, %v2374_v8 }
 0x302   :  { %v886_v44 = vmax.f32 %v870_v43, 0.0 }
 0x304   :  { %911 = vst.msk [vmem:[#allocation2 + $0x1c] sm:$0xf] %vm899_vm12, %v886_v44 }
 0x305   :  { %v760_v45 = vpop.f32.mrf.mxu1 }
 0x306   :  { %v2854_v46 = vadd.f32 %v2795_v13, %v760_v45  ;;  %v606_v47 = vpop.permute.xlu1 %605 }
 0x307   :  { %639 = vst.msk [vmem:[#allocation2 + $0x76] sm:$0xff] %vm195_vm6, %v606_v47  ;;  %v822_v49 = vpop.permute.xlu0 %821 }
 0x308   :  { %v868_v51 = vadd.f32 %v822_v49, %v788_v48  ;;  %2283 = vmatmul.msk.f32.gmra.mxu1 %vm243_vm7, %v662_v50  ;;  %833 = vrot.lane.b32.xlu1 %v2854_v46, %s2375_s11  ;;  %v794_v23 = vmax.f32 %v2854_v46, 0.0 }
 0x30a   :  { %v884_v52 = vmax.f32 %v868_v51, 0.0 }
 0x30c   :  { %909 = vst.msk [vmem:[#allocation2 + $0xc] sm:$0xf] %vm899_vm12, %v884_v52  ;;  %942 = vrot.lane.b32.xlu0 %v884_v52, %s2372_s20  ;;  %1006 = vrot.lane.b32.xlu2 %v884_v52, %s2373_s21 }
 0x30d   :  { %v763_v53 = vpop.f32.mrf.mxu1 }
 0x30e   :  { %v824_v56 = vpop.permute.xlu1 %823  ;;  %v663_v57 = vld [vmem:[#allocation2 + $0x70] sm:$0xff]  ;;  %v664_v1 = vld [vmem:[#allocation2 + $0x78] sm:$0xff]  ;;  %v2888_v10 = vadd.f32 %v2795_v13, %v763_v53 }
 0x30f   :  { %v869_v58 = vadd.f32 %v824_v56, %v789_v54  ;;  %907 = vst.msk [vmem:[#allocation2 + $0x70] sm:$0xf] %vm899_vm12, %v2374_v8 }
 0x310   :  { %2284 = vmatmul.msk.f32.gmra.mxu1 %vm243_vm7, %v663_v57  ;;  %v795_v45 = vmax.f32 %v2888_v10, 0.0 }
 0x311   :  { %v885_v59 = vmax.f32 %v869_v58, 0.0 }
 0x313   :  { %910 = vst.msk [vmem:[#allocation2 + $0x14] sm:$0xff] %vm46_vm0, %v885_v59  ;;  %1008 = vrot.lane.b32.xlu1 %v885_v59, %s2373_s21 }
 0x314   :  { %831 = vrot.lane.b32.xlu0 %v2869_v60, %s2375_s11  ;;  %944 = vrot.lane.b32.xlu2 %v885_v59, %s2372_s20 }
 0x315   :  { %v828_v62 = vpop.permute.xlu0 %827  ;;  %v766_v63 = vpop.f32.mrf.mxu1 }
 0x316   :  { %v871_v0 = vadd.f32 %v828_v62, %v791_v61  ;;  %v2879_v3 = vadd.f32 %v2795_v13, %v766_v63 }
 0x318   :  { %v887_v2 = vmax.f32 %v871_v0, 0.0  ;;  %2285 = vmatmul.msk.f32.gmra.mxu1 %vm243_vm7, %v664_v1  ;;  %v796_v38 = vmax.f32 %v2879_v3, 0.0 }
 0x31a   :  { %912 = vst.msk [vmem:[#allocation2 + $0x24] sm:$0xff] %vm46_vm0, %v887_v2 }
 0x31b   :  { %837 = vrot.lane.b32.xlu1 %v2879_v3, %s2375_s11 }
 0x31c   :  { %946 = vrot.lane.b32.xlu0 %v886_v44, %s2372_s20  ;;  %1010 = vrot.lane.b32.xlu2 %v886_v44, %s2373_s21 }
 0x31d   :  { %v830_v5 = vpop.permute.xlu1 %829  ;;  %v769_v6 = vpop.f32.mrf.mxu1 }
 0x31e   :  { %v872_v7 = vadd.f32 %v830_v5, %v792_v4  ;;  %v2903_v14 = vadd.f32 %v2795_v13, %v769_v6 }
 0x320   :  { %v888_v9 = vmax.f32 %v872_v7, 0.0  ;;  %v797_v62 = vmax.f32 %v2903_v14, 0.0 }
 0x322   :  { %913 = vst.msk [vmem:[#allocation2 + $0x2c] sm:$0xf] %vm899_vm12, %v888_v9 }
 0x323   :  { %1012 = vrot.lane.b32.xlu1 %v887_v2, %s2373_s21 }
 0x324   :  { %835 = vrot.lane.b32.xlu0 %v2888_v10, %s2375_s11  ;;  %948 = vrot.lane.b32.xlu2 %v887_v2, %s2372_s20 }
 0x325   :  { %v772_v11 = vpop.f32.mrf.mxu1 }
 0x326   :  { %v2896_v12 = vadd.f32 %v2795_v13, %v772_v11 }
 0x328   :  { %v798_v52 = vmax.f32 %v2896_v12, 0.0 }
 0x32b   :  { %841 = vrot.lane.b32.xlu1 %v2896_v12, %s2375_s11 }
 0x32c   :  { %950 = vrot.lane.b32.xlu0 %v888_v9, %s2372_s20  ;;  %1014 = vrot.lane.b32.xlu2 %v888_v9, %s2373_s21 }
 0x334   :  { %839 = vrot.lane.b32.xlu0 %v2903_v14, %s2375_s11 }
 0x356   :  { %v941_v15 = vpop.permute.xlu2 %940 }
 0x357   :  { %988 = vst.msk [vmem:[#allocation2] sm:$0xff] %vm128_vm3, %v941_v15 }
 0x366   :  { %v1007_v18 = vpop.permute.xlu2 %1006 }
 0x36e   :  { %v1005_v20 = vpop.permute.xlu1 %1004  ;;  %v945_v21 = vpop.permute.xlu2 %944 }
 0x36f   :  { %1053 = vst.msk [vmem:[#allocation2 - $0x4] sm:$0xf0] %vm1052_vm13, %v1005_v20 }
 0x370   :  { %990 = vst.msk [vmem:[#allocation2 + $0x10] sm:$0xff] %vm128_vm3, %v945_v21 }
 0x376   :  { %v1011_v22 = vpop.permute.xlu2 %1010 }
 0x37a   :  { %v834_v24 = vpop.permute.xlu1 %833 }
 0x37b   :  { %v874_v25 = vadd.f32 %v834_v24, %v794_v23 }
 0x37d   :  { %v890_v26 = vmax.f32 %v874_v25, 0.0  ;;  %v775_v28 = vpop.f32.mrf.mxu1 }
 0x37e   :  { %v943_v27 = vpop.permute.xlu0 %942  ;;  %v949_v29 = vpop.permute.xlu2 %948  ;;  %v2928_v30 = vadd.f32 %v2795_v13, %v775_v28 }
 0x37f   :  { %915 = vst.msk [vmem:[#allocation2 + $0x3c] sm:$0xf] %vm899_vm12, %v890_v26  ;;  %954 = vrot.lane.b32.xlu0 %v890_v26, %s2372_s20 }
 0x380   :  { %989 = vst.msk [vmem:[#allocation2 + $0x8] sm:$0xff] %vm128_vm3, %v943_v27  ;;  %v799_v7 = vmax.f32 %v2928_v30, 0.0 }
 0x381   :  { %1054 = vst.msk [vmem:[#allocation2 + $0x4] sm:$0xff] %vm195_vm6, %v1007_v18 }
 0x382   :  { %1070 = vst.msk [vmem:[#allocation2 + $0xc] sm:$0xf] %vm1069_vm14, %v2374_v8 }
 0x383   :  { %992 = vst.msk [vmem:[#allocation2 + $0x20] sm:$0xff] %vm128_vm3, %v949_v29 }
 0x385   :  { %v1009_v32 = vpop.permute.xlu1 %1008  ;;  %v778_v37 = vpop.f32.mrf.mxu1 }
 0x386   :  { %v832_v33 = vpop.permute.xlu0 %831  ;;  %1055 = vst.msk [vmem:[#allocation2 + $0xc] sm:$0xf0] %vm1052_vm13, %v1009_v32  ;;  %v2942_v43 = vadd.f32 %v2795_v13, %v778_v37  ;;  %v1015_v58 = vpop.permute.xlu2 %1014  ;;  %v3025_v37 = vld [vmem:[%s3696_s2 + $0x2] ss:$0 sm:$0xff] }
 0x387   :  { %v873_v34 = vadd.f32 %v832_v33, %v793_v31  ;;  %843 = vrot.lane.b32.xlu0 %v2928_v30, %s2375_s11 }
 0x388   :  { %v1078_v35 = vld [vmem:[#allocation2] sm:$0xff]  ;;  %v800_v16 = vmax.f32 %v2942_v43, 0.0 }
 0x389   :  { %v889_v36 = vmax.f32 %v873_v34, 0.0  ;;  %2290 = vmatmul.msk.f32.vlgmr.msra.gmra.mxu2 %vm243_vm7, %v1078_v35  ;;  %v1079_v55 = vld [vmem:[#allocation2 + $0x8] sm:$0xff] }
 0x38b   :  { %914 = vst.msk [vmem:[#allocation2 + $0x34] sm:$0xff] %vm46_vm0, %v889_v36  ;;  %1016 = vrot.lane.b32.xlu1 %v889_v36, %s2373_s21  ;;  %952 = vrot.lane.b32.xlu2 %v889_v36, %s2372_s20 }
 0x38d   :  { %v838_v39 = vpop.permute.xlu1 %837  ;;  %v781_v44 = vpop.f32.mrf.mxu1 }
 0x38e   :  { %v947_v40 = vpop.permute.xlu0 %946  ;;  %v876_v41 = vadd.f32 %v838_v39, %v796_v38  ;;  %v2955_v50 = vadd.f32 %v2795_v13, %v781_v44 }
 0x38f   :  { %991 = vst.msk [vmem:[#allocation2 + $0x18] sm:$0xff] %vm128_vm3, %v947_v40 }
 0x390   :  { %1056 = vst.msk [vmem:[#allocation2 + $0x14] sm:$0xff] %vm195_vm6, %v1011_v22  ;;  %v892_v42 = vmax.f32 %v876_v41, 0.0  ;;  %v801_v22 = vmax.f32 %v2955_v50, 0.0 }
 0x391   :  { %1071 = vst.msk [vmem:[#allocation2 + $0x1c] sm:$0xf] %vm1069_vm14, %v2374_v8  ;;  %2291 = vmatmul.msk.f32.gmra.mxu2 %vm243_vm7, %v1079_v55 }
 0x392   :  { %917 = vst.msk [vmem:[#allocation2 + $0x4c] sm:$0xf] %vm899_vm12, %v892_v42  ;;  %958 = vrot.lane.b32.xlu0 %v892_v42, %s2372_s20 }
 0x393   :  { %845 = vrot.lane.b32.xlu1 %v2942_v43, %s2375_s11  ;;  %1018 = vrot.lane.b32.xlu2 %v890_v26, %s2373_s21 }
 0x395   :  { %v1013_v46 = vpop.permute.xlu1 %1012  ;;  %v784_v54 = vpop.f32.mrf.mxu1 }
 0x396   :  { %v836_v47 = vpop.permute.xlu0 %835  ;;  %1057 = vst.msk [vmem:[#allocation2 + $0x1c] sm:$0xf0] %vm1052_vm13, %v1013_v46  ;;  %v2967_v61 = vadd.f32 %v2795_v13, %v784_v54 }
 0x397   :  { %v875_v48 = vadd.f32 %v836_v47, %v795_v45  ;;  %v1080_v49 = vld [vmem:[#allocation2 + $0x10] sm:$0xff] }
 0x398   :  { %v1081_v60 = vld [vmem:[#allocation2 + $0x18] sm:$0xff]  ;;  %v802_v31 = vmax.f32 %v2967_v61, 0.0 }
 0x399   :  { %v891_v51 = vmax.f32 %v875_v48, 0.0  ;;  %2292 = vmatmul.msk.f32.gmra.mxu2 %vm243_vm7, %v1080_v49 }
 0x39a   :  { %847 = vrot.lane.b32.xlu0 %v2955_v50, %s2375_s11 }
 0x39b   :  { %916 = vst.msk [vmem:[#allocation2 + $0x44] sm:$0xff] %vm46_vm0, %v891_v51  ;;  %1020 = vrot.lane.b32.xlu1 %v891_v51, %s2373_s21  ;;  %956 = vrot.lane.b32.xlu2 %v891_v51, %s2372_s20 }
 0x39d   :  { %v842_v53 = vpop.permute.xlu1 %841 }
 0x39e   :  { %v951_v56 = vpop.permute.xlu0 %950  ;;  %v878_v57 = vadd.f32 %v842_v53, %v798_v52 }
 0x39f   :  { %993 = vst.msk [vmem:[#allocation2 + $0x28] sm:$0xff] %vm128_vm3, %v951_v56 }
 0x3a0   :  { %1058 = vst.msk [vmem:[#allocation2 + $0x24] sm:$0xff] %vm195_vm6, %v1015_v58  ;;  %v894_v59 = vmax.f32 %v878_v57, 0.0 }
 0x3a1   :  { %1072 = vst.msk [vmem:[#allocation2 + $0x2c] sm:$0xf] %vm1069_vm14, %v2374_v8  ;;  %2293 = vmatmul.msk.f32.gmra.mxu2 %vm243_vm7, %v1081_v60 }
 0x3a2   :  { %919 = vst.msk [vmem:[#allocation2 + $0x5c] sm:$0xf] %vm899_vm12, %v894_v59  ;;  %962 = vrot.lane.b32.xlu0 %v894_v59, %s2372_s20 }
 0x3a3   :  { %849 = vrot.lane.b32.xlu1 %v2967_v61, %s2375_s11  ;;  %1022 = vrot.lane.b32.xlu2 %v892_v42, %s2373_s21 }
 0x3a6   :  { %v840_v63 = vpop.permute.xlu0 %839 }
 0x3a7   :  { %v877_v0 = vadd.f32 %v840_v63, %v797_v62  ;;  %v1082_v13 = vld [vmem:[#allocation2 + $0x20] sm:$0xff] }
 0x3a8   :  { %v1083_v2 = vld [vmem:[#allocation2 + $0x28] sm:$0xff] }
 0x3a9   :  { %v893_v1 = vmax.f32 %v877_v0, 0.0  ;;  %2294 = vmatmul.msk.f32.gmra.mxu2 %vm243_vm7, %v1082_v13 }
 0x3ab   :  { %918 = vst.msk [vmem:[#allocation2 + $0x54] sm:$0xff] %vm46_vm0, %v893_v1  ;;  %1024 = vrot.lane.b32.xlu1 %v893_v1, %s2373_s21  ;;  %960 = vrot.lane.b32.xlu2 %v893_v1, %s2372_s20 }
 0x3b1   :  { %2295 = vmatmul.msk.f32.gmra.mxu2 %vm243_vm7, %v1083_v2 }
 0x3b3   :  { %1026 = vrot.lane.b32.xlu2 %v894_v59, %s2373_s21 }
 0x3e5   :  { %v953_v3 = vpop.permute.xlu2 %952 }
 0x3e6   :  { %994 = vst.msk [vmem:[#allocation2 + $0x30] sm:$0xff] %vm128_vm3, %v953_v3 }
 0x3ed   :  { %v1019_v4 = vpop.permute.xlu2 %1018 }
 0x3f1   :  { %v955_v5 = vpop.permute.xlu0 %954 }
 0x3f2   :  { %995 = vst.msk [vmem:[#allocation2 + $0x38] sm:$0xff] %vm128_vm3, %v955_v5 }
 0x3f3   :  { %1073 = vst.msk [vmem:[#allocation2 + $0x3c] sm:$0xf] %vm1069_vm14, %v2374_v8 }
 0x3f4   :  { %1060 = vst.msk [vmem:[#allocation2 + $0x34] sm:$0xff] %vm195_vm6, %v1019_v4 }
 0x3f5   :  { %v957_v6 = vpop.permute.xlu2 %956 }
 0x3f6   :  { %996 = vst.msk [vmem:[#allocation2 + $0x40] sm:$0xff] %vm128_vm3, %v957_v6 }
 0x3f9   :  { %v844_v9 = vpop.permute.xlu0 %843 }
 0x3fa   :  { %v879_v10 = vadd.f32 %v844_v9, %v799_v7 }
 0x3fb   :  { %v1085_v27 = vld [vmem:[#allocation2 + $0x38] sm:$0xff] }
 0x3fc   :  { %v895_v11 = vmax.f32 %v879_v10, 0.0 }
 0x3fd   :  { %v1017_v12 = vpop.permute.xlu1 %1016  ;;  %v1023_v14 = vpop.permute.xlu2 %1022 }
 0x3fe   :  { %920 = vst.msk [vmem:[#allocation2 + $0x64] sm:$0xff] %vm46_vm0, %v895_v11  ;;  %964 = vrot.lane.b32.xlu0 %v895_v11, %s2372_s20  ;;  %1028 = vrot.lane.b32.xlu2 %v895_v11, %s2373_s21 }
 0x3ff   :  { %1059 = vst.msk [vmem:[#allocation2 + $0x2c] sm:$0xf0] %vm1052_vm13, %v1017_v12 }
 0x404   :  { %v959_v15 = vpop.permute.xlu0 %958 }
 0x405   :  { %997 = vst.msk [vmem:[#allocation2 + $0x48] sm:$0xff] %vm128_vm3, %v959_v15  ;;  %v846_v17 = vpop.permute.xlu1 %845  ;;  %v961_v18 = vpop.permute.xlu2 %960 }
 0x406   :  { %1074 = vst.msk [vmem:[#allocation2 + $0x4c] sm:$0xf] %vm1069_vm14, %v2374_v8  ;;  %v880_v19 = vadd.f32 %v846_v17, %v800_v16  ;;  %v1084_v20 = vld [vmem:[#allocation2 + $0x30] sm:$0xff] }
 0x407   :  { %1062 = vst.msk [vmem:[#allocation2 + $0x44] sm:$0xff] %vm195_vm6, %v1023_v14  ;;  %2296 = vmatmul.msk.f32.gmra.mxu2 %vm243_vm7, %v1084_v20 }
 0x408   :  { %v896_v21 = vmax.f32 %v880_v19, 0.0  ;;  %998 = vst.msk [vmem:[#allocation2 + $0x50] sm:$0xff] %vm128_vm3, %v961_v18 }
 0x40a   :  { %921 = vst.msk [vmem:[#allocation2 + $0x6c] sm:$0xf] %vm899_vm12, %v896_v21  ;;  %1030 = vrot.lane.b32.xlu0 %v896_v21, %s2373_s21  ;;  %966 = vrot.lane.b32.xlu1 %v896_v21, %s2372_s20 }
 0x40c   :  { %v1168_v23 = vpop.f32.mrf.mxu2  ;;  %v848_v24 = vpop.permute.xlu0 %847 }
 0x40d   :  { %v881_v25 = vadd.f32 %v848_v24, %v801_v22  ;;  %v1021_v26 = vpop.permute.xlu1 %1020  ;;  %v1027_v34 = vpop.permute.xlu2 %1026  ;;  %v1169_v41 = vadd.f32 %v3025_v37, %v1168_v23 }
 0x40e   :  { %1061 = vst.msk [vmem:[#allocation2 + $0x3c] sm:$0xf0] %vm1052_vm13, %v1021_v26  ;;  %v1087_v40 = vld [vmem:[#allocation2 + $0x48] sm:$0xff] }
 0x40f   :  { %v897_v28 = vmax.f32 %v881_v25, 0.0  ;;  %2297 = vmatmul.msk.f32.gmra.mxu2 %vm243_vm7, %v1085_v27  ;;  %v1216_v13 = vmax.f32 %v1169_v41, 0.0 }
 0x411   :  { %922 = vst.msk [vmem:[#allocation2 + $0x74] sm:$0xff] %vm46_vm0, %v897_v28 }
 0x412   :  { %1032 = vrot.lane.b32.xlu0 %v897_v28, %s2373_s21  ;;  %968 = vrot.lane.b32.xlu1 %v897_v28, %s2372_s20 }
 0x414   :  { %v3011_v29 = vpop.f32.mrf.mxu2  ;;  %v963_v30 = vpop.permute.xlu0 %962 }
 0x415   :  { %999 = vst.msk [vmem:[#allocation2 + $0x58] sm:$0xff] %vm128_vm3, %v963_v30  ;;  %v850_v32 = vpop.permute.xlu1 %849  ;;  %v1086_v33 = vld [vmem:[#allocation2 + $0x40] sm:$0xff] }
 0x416   :  { %1075 = vst.msk [vmem:[#allocation2 + $0x5c] sm:$0xf] %vm1069_vm14, %v2374_v8  ;;  %v882_v35 = vadd.f32 %v850_v32, %v802_v31 }
 0x417   :  { %1064 = vst.msk [vmem:[#allocation2 + $0x54] sm:$0xff] %vm195_vm6, %v1027_v34  ;;  %2298 = vmatmul.msk.f32.gmra.mxu2 %vm243_vm7, %v1086_v33 }
 0x418   :  { %v898_v36 = vmax.f32 %v882_v35, 0.0 }
 0x41a   :  { %923 = vst.msk [vmem:[#allocation2 + $0x7c] sm:$0xf] %vm899_vm12, %v898_v36  ;;  %1034 = vrot.lane.b32.xlu1 %v898_v36, %s2373_s21  ;;  %970 = vrot.lane.b32.xlu2 %v898_v36, %s2372_s20 }
 0x41c   :  { %v1174_v38 = vpop.f32.mrf.mxu2 }
 0x41d   :  { %v1025_v39 = vpop.permute.xlu1 %1024  ;;  %v1175_v42 = vadd.f32 %v3025_v37, %v1174_v38 }
 0x41e   :  { %1063 = vst.msk [vmem:[#allocation2 + $0x4c] sm:$0xf0] %vm1052_vm13, %v1025_v39  ;;  %v1089_v46 = vld [vmem:[#allocation2 + $0x58] sm:$0xff] }
 0x41f   :  { %2299 = vmatmul.msk.f32.gmra.mxu2 %vm243_vm7, %v1087_v40  ;;  %v1218_v52 = vmax.f32 %v1175_v42, 0.0 }
 0x422   :  { %1252 = vrot.lane.b32.xlu2 %v1175_v42, %s2375_s11  ;;  %1248 = vrot.lane.b32.xlu1 %v1169_v41, %s2375_s11  ;;  %v3086_v42 = vadd.f32 %v3025_v37, %v3011_v29 }
 0x424   :  { %v1177_v55 = vpop.f32.mrf.mxu2 }
 0x425   :  { %v1088_v43 = vld [vmem:[#allocation2 + $0x50] sm:$0xff]  ;;  %v1178_v17 = vadd.f32 %v3025_v37, %v1177_v55 }
 0x427   :  { %2300 = vmatmul.msk.f32.gmra.mxu2 %vm243_vm7, %v1088_v43 }
 0x42c   :  { %v1180_v44 = vpop.f32.mrf.mxu2 }
 0x42d   :  { %v1181_v45 = vadd.f32 %v3025_v37, %v1180_v44  ;;  %v1219_v44 = vmax.f32 %v1178_v17, 0.0 }
 0x42f   :  { %2301 = vmatmul.msk.f32.gmra.mxu2 %vm243_vm7, %v1089_v46  ;;  %1256 = vrot.lane.b32.xlu0 %v1181_v45, %s2375_s11  ;;  %v1220_v9 = vmax.f32 %v1181_v45, 0.0 }
 0x434   :  { %v1183_v57 = vpop.f32.mrf.mxu2 }
 0x435   :  { %v1184_v31 = vadd.f32 %v3025_v37, %v1183_v57 }
 0x458   :  { %v1029_v47 = vpop.permute.xlu2 %1028 }
 0x470   :  { %v965_v48 = vpop.permute.xlu0 %964 }
 0x471   :  { %1000 = vst.msk [vmem:[#allocation2 + $0x60] sm:$0xff] %vm128_vm3, %v965_v48 }
 0x472   :  { %1065 = vst.msk [vmem:[#allocation2 + $0x5c] sm:$0xf0] %vm1052_vm13, %v1029_v47 }
 0x474   :  { %v971_v49 = vpop.permute.xlu2 %970 }
 0x475   :  { %1003 = vst.msk [vmem:[#allocation2 + $0x78] sm:$0xff] %vm128_vm3, %v971_v49 }
 0x476   :  { %1077 = vst.msk [vmem:[#allocation2 + $0x7c] sm:$0xf] %vm1069_vm14, %v2374_v8 }
 0x47c   :  { %v1031_v50 = vpop.permute.xlu0 %1030  ;;  %v967_v51 = vpop.permute.xlu1 %966 }
 0x47d   :  { %1001 = vst.msk [vmem:[#allocation2 + $0x68] sm:$0xff] %vm128_vm3, %v967_v51  ;;  %v1253_v53 = vpop.permute.xlu2 %1252 }
 0x47e   :  { %1066 = vst.msk [vmem:[#allocation2 + $0x64] sm:$0xff] %vm195_vm6, %v1031_v50  ;;  %v1298_v54 = vadd.f32 %v1253_v53, %v1218_v52 }
 0x47f   :  { %1076 = vst.msk [vmem:[#allocation2 + $0x6c] sm:$0xf] %vm1069_vm14, %v2374_v8 }
 0x480   :  { %v1314_v56 = vmax.f32 %v1298_v54, 0.0 }
 0x482   :  { %1330 = vst.msk [vmem:[#allocation2 + $0x10] sm:$0xff] %vm46_vm0, %v1314_v56 }
 0x484   :  { %v1033_v58 = vpop.permute.xlu0 %1032  ;;  %v969_v59 = vpop.permute.xlu1 %968 }
 0x485   :  { %1002 = vst.msk [vmem:[#allocation2 + $0x70] sm:$0xff] %vm128_vm3, %v969_v59  ;;  %v1090_v60 = vld [vmem:[#allocation2 + $0x60] sm:$0xff]  ;;  %vm1381_vm3 = vcmask 1044484  }
 0x486   :  { %1067 = vst.msk [vmem:[#allocation2 + $0x6c] sm:$0xf0] %vm1052_vm13, %v1033_v58  ;;  %2302 = vmatmul.msk.f32.gmra.mxu2 %vm243_vm7, %v1090_v60  ;;  %v1091_v8 = vld [vmem:[#allocation2 + $0x68] sm:$0xff] }
 0x48a   :  { %v1186_v61 = vpop.f32.mrf.mxu2 }
 0x48b   :  { %v1187_v62 = vadd.f32 %v3025_v37, %v1186_v61  ;;  %v3105_v61 = vld [vmem:[#allocation2 + $0x11] sm:$0x1] }
 0x48c   :  { %v1035_v63 = vpop.permute.xlu1 %1034 }
 0x48d   :  { %1068 = vst.msk [vmem:[#allocation2 + $0x74] sm:$0xff] %vm195_vm6, %v1035_v63  ;;  %1260 = vrot.lane.b32.xlu2 %v1187_v62, %s2375_s11  ;;  %v1222_v19 = vmax.f32 %v1187_v62, 0.0  ;;  %v3107_v62 = vld [vmem:[#allocation2 + $0x10] sm:$0x1]  ;;  %vm1390_vm6 = vcmask 1047559  }
 0x48e   :  { %2303 = vmatmul.msk.f32.gmra.mxu2 %vm243_vm7, %v1091_v8  ;;  %v3109_v8 = vld [vmem:[#allocation2 + $0x12] sm:$0x1] }
 0x492   :  { %v1189_v0 = vpop.f32.mrf.mxu2 }
 0x493   :  { %v1190_v18 = vadd.f32 %v3025_v37, %v1189_v0 }
 0x494   :  { %v1249_v1 = vpop.permute.xlu1 %1248  ;;  %v1092_v2 = vld [vmem:[#allocation2 + $0x70] sm:$0xff]  ;;  %v1093_v7 = vld [vmem:[#allocation2 + $0x78] sm:$0xff] }
 0x495   :  { %v1296_v3 = vadd.f32 %v1249_v1, %v1216_v13  ;;  %v1223_v48 = vmax.f32 %v1190_v18, 0.0  ;;  %v1371_v1 = vrot.slane %v3105_v61, 7 }
 0x496   :  { %2304 = vmatmul.msk.f32.gmra.mxu2 %vm243_vm7, %v1092_v2  ;;  %v1422_v2 = vrot.slane %v3107_v62, 7 }
 0x497   :  { %v1312_v4 = vmax.f32 %v1296_v3, 0.0  ;;  %v3114_v3 = vld [vmem:[#allocation2 + $0x13] sm:$0x1] }
 0x499   :  { %1328 = vst.msk [vmem:[#allocation2] sm:$0xff] %vm46_vm0, %v1312_v4 }
 0x49a   :  { %v1192_v5 = vpop.f32.mrf.mxu2 }
 0x49b   :  { %v1193_v6 = vadd.f32 %v3025_v37, %v1192_v5 }
 0x49d   :  { %1264 = vrot.lane.b32.xlu0 %v1193_v6, %s2375_s11  ;;  %v1224_v26 = vmax.f32 %v1193_v6, 0.0 }
 0x49e   :  { %2305 = vmatmul.msk.f32.gmra.mxu2 %vm243_vm7, %v1093_v7 }
 0x4a1   :  { %v1257_v10 = vpop.permute.xlu0 %1256 }
 0x4a2   :  { %v1300_v11 = vadd.f32 %v1257_v10, %v1220_v9  ;;  %v1195_v12 = vpop.f32.mrf.mxu2 }
 0x4a3   :  { %v1196_v35 = vadd.f32 %v3025_v37, %v1195_v12  ;;  %v2306_v12 = vld [vmem:[%s3697_s3 + $0x8] sm:$0xff] }
 0x4a4   :  { %v1316_v14 = vmax.f32 %v1300_v11, 0.0  ;;  %1409 = vmatpush.msra.mxu3 %v2306_v12 }
 0x4a5   :  { %v1225_v60 = vmax.f32 %v1196_v35, 0.0 }
 0x4a6   :  { %1332 = vst.msk [vmem:[#allocation2 + $0x20] sm:$0xff] %vm46_vm0, %v1316_v14  ;;  %v1352_v14 = vld [vmem:[%s3697_s3] sm:$0xff] }
 0x4a7   :  { %1453 = vmatpush.msrb.mxu3 %v1352_v14 }
 0x4aa   :  { %v1198_v15 = vpop.f32.mrf.mxu2 }
 0x4ab   :  { %v1199_v16 = vadd.f32 %v3025_v37, %v1198_v15 }
 0x4ad   :  { %1268 = vrot.lane.b32.xlu1 %v1199_v16, %s2375_s11  ;;  %v1226_v38 = vmax.f32 %v1199_v16, 0.0  ;;  %v3116_v5 = vld [vmem:[#allocation2 + $0x21] sm:$0x1]  ;;  %v3118_v6 = vld [vmem:[#allocation2 + $0x20] sm:$0x1] }
 0x4ae   :  { %v3121_v9 = vld [vmem:[#allocation2 + $0x22] sm:$0x1]  ;;  %v3123_v10 = vld [vmem:[#allocation2 + $0x23] sm:$0x1]  ;;  %v3125_v11 = vld [vmem:[#allocation2 + $0x24] sm:$0x1] }
 0x4af   :  { %3707 = vst [vmem:[#allocation6_spill] sm:$0xff] %v3125_v11  ;;  %v1458_v16 = vld [vmem:[#allocation2 + $0x2] sm:$0x1] }
 0x4b2   :  { %v1201_v23 = vpop.f32.mrf.mxu2 }
 0x4b3   :  { %v3097_v47 = vadd.f32 %v3025_v37, %v1201_v23 }
 0x4b5   :  { %1254 = vrot.lane.b32.xlu1 %v1178_v17, %s2375_s11 }
 0x4bd   :  { %1262 = vrot.lane.b32.xlu1 %v1190_v18, %s2375_s11 }
 0x4e7   :  { %v1261_v20 = vpop.permute.xlu2 %1260 }
 0x4e8   :  { %v1302_v21 = vadd.f32 %v1261_v20, %v1222_v19 }
 0x4ea   :  { %v1318_v22 = vmax.f32 %v1302_v21, 0.0 }
 0x4ec   :  { %1334 = vst.msk [vmem:[#allocation2 + $0x30] sm:$0xff] %vm46_vm0, %v1318_v22 }
 0x4f3   :  { %v3134_v15 = vld [vmem:[#allocation2 + $0x31] sm:$0x1]  ;;  %v3137_v17 = vld [vmem:[#allocation2 + $0x30] sm:$0x1]  ;;  %v3139_v18 = vld [vmem:[#allocation2 + $0x32] sm:$0x1] }
 0x4f4   :  { %v3141_v19 = vld [vmem:[#allocation2 + $0x33] sm:$0x1] }
 0x509   :  { %v1204_v24 = vpop.f32.mrf.mxu2 }
 0x50a   :  { %v1205_v25 = vadd.f32 %v3025_v37, %v1204_v24 }
 0x50c   :  { %1272 = vrot.lane.b32.xlu2 %v1205_v25, %s2375_s11  ;;  %v1228_v52 = vmax.f32 %v1205_v25, 0.0 }
 0x50f   :  { %v1265_v27 = vpop.permute.xlu0 %1264 }
 0x510   :  { %v1304_v28 = vadd.f32 %v1265_v27, %v1224_v26  ;;  %v1344_v27 = vld [vmem:[#allocation2] sm:$0x1]  ;;  %v1513_v26 = vld [vmem:[#allocation2 + $0x3] sm:$0x1] }
 0x511   :  { %v1207_v30 = vpop.f32.mrf.mxu2 }
 0x512   :  { %v1320_v32 = vmax.f32 %v1304_v28, 0.0  ;;  %v3071_v33 = vadd.f32 %v3025_v37, %v1207_v30 }
 0x514   :  { %1336 = vst.msk [vmem:[#allocation2 + $0x40] sm:$0xff] %vm46_vm0, %v1320_v32  ;;  %1258 = vrot.lane.b32.xlu2 %v1184_v31, %s2375_s11  ;;  %1274 = vrot.lane.b32.xlu1 %v3071_v33, %s2375_s11  ;;  %v1353_v32 = vld [vmem:[#allocation2 + $0x1] sm:$0x1] }
 0x519   :  { %v1210_v34 = vpop.f32.mrf.mxu2 }
 0x51a   :  { %v3079_v36 = vadd.f32 %v3025_v37, %v1210_v34 }
 0x51c   :  { %1276 = vrot.lane.b32.xlu0 %v3079_v36, %s2375_s11  ;;  %1266 = vrot.lane.b32.xlu2 %v1196_v35, %s2375_s11  ;;  %v3154_v35 = vld [vmem:[#allocation2 + $0x41] sm:$0x1] }
 0x51f   :  { %v1269_v39 = vpop.permute.xlu1 %1268 }
 0x520   :  { %v1306_v40 = vadd.f32 %v1269_v39, %v1226_v38  ;;  %v3156_v38 = vld [vmem:[#allocation2 + $0x40] sm:$0x1]  ;;  %v3158_v39 = vld [vmem:[#allocation2 + $0x42] sm:$0x1] }
 0x521   :  { %v1213_v41 = vpop.f32.mrf.mxu2 }
 0x522   :  { %v1322_v55 = vmax.f32 %v1306_v40, 0.0  ;;  %v3089_v43 = vadd.f32 %v3025_v37, %v1213_v41  ;;  %v1221_v37 = vmax.f32 %v1184_v31, 0.0  ;;  %v1229_v41 = vmax.f32 %v3071_v33, 0.0 }
 0x524   :  { %1338 = vst.msk [vmem:[#allocation2 + $0x50] sm:$0xff] %vm46_vm0, %v1322_v55  ;;  %1278 = vrot.lane.b32.xlu2 %v3089_v43, %s2375_s11  ;;  %1250 = vrot.lane.b32.xlu0 %v3086_v42, %s2375_s11  ;;  %v1231_v20 = vmax.f32 %v3089_v43, 0.0  ;;  %v3163_v43 = vld [vmem:[#allocation2 + $0x43] sm:$0x1] }
 0x527   :  { %v1255_v45 = vpop.permute.xlu1 %1254 }
 0x528   :  { %v1299_v46 = vadd.f32 %v1255_v45, %v1219_v44 }
 0x52a   :  { %v1315_v29 = vmax.f32 %v1299_v46, 0.0 }
 0x52b   :  { %v3161_v55 = vld [vmem:[#allocation2 + $0x51] sm:$0x1]  ;;  %v3165_v44 = vld [vmem:[#allocation2 + $0x50] sm:$0x1]  ;;  %v3167_v45 = vld [vmem:[#allocation2 + $0x52] sm:$0x1] }
 0x52c   :  { %1331 = vst.msk [vmem:[#allocation2 + $0x18] sm:$0xff] %vm46_vm0, %v1315_v29  ;;  %1270 = vrot.lane.b32.xlu0 %v3097_v47, %s2375_s11  ;;  %v3169_v46 = vld [vmem:[#allocation2 + $0x53] sm:$0x1]  ;;  %v1230_v29 = vmax.f32 %v3079_v36, 0.0 }
 0x52f   :  { %v1263_v49 = vpop.permute.xlu1 %1262 }
 0x530   :  { %v1303_v50 = vadd.f32 %v1263_v49, %v1223_v48 }
 0x532   :  { %v1319_v51 = vmax.f32 %v1303_v50, 0.0 }
 0x533   :  { %v3173_v48 = vld [vmem:[#allocation2 + $0x18] sm:$0x1]  ;;  %v3175_v49 = vld [vmem:[#allocation2 + $0x19] sm:$0x1]  ;;  %v3195_v12 = vld [vmem:[#allocation2 + $0x1e] sm:$0x1] }
 0x534   :  { %1335 = vst.msk [vmem:[#allocation2 + $0x38] sm:$0xff] %vm46_vm0, %v1319_v51  ;;  %v3197_v14 = vld [vmem:[#allocation2 + $0x1f] sm:$0x1] }
 0x535   :  { %3708 = vst [vmem:[#allocation7_spill] sm:$0xff] %v3197_v14 }
 0x53b   :  { %v3223_v36 = vld [vmem:[#allocation2 + $0x3e] sm:$0x1] }
 0x53c   :  { %3711 = vst [vmem:[#allocation10_spill] sm:$0xff] %v3223_v36 }
 0x566   :  { %v1273_v53 = vpop.permute.xlu2 %1272 }
 0x567   :  { %v1308_v54 = vadd.f32 %v1273_v53, %v1228_v52  ;;  %v1373_v53 = vsel %vm1372_vm15, %v1371_v1, %v1353_v32  ;;  %v3719_v1 = vrot.slane %v3154_v35, 4  ;;  %v3721_v35 = vrot.slane %v3161_v55, 3 }
 0x568   :  { %v3725_v55 = vrot.slane %v3137_v17, 5  ;;  %v3728_v17 = vrot.slane %v3156_v38, 4 }
 0x569   :  { %v1324_v56 = vmax.f32 %v1308_v54, 0.0  ;;  %v3229_v54 = vld [vmem:[#allocation2 + $0x3f] sm:$0x1] }
 0x56a   :  { %3712 = vst [vmem:[#allocation11_spill] sm:$0xff] %v3229_v54 }
 0x56b   :  { %1340 = vst.msk [vmem:[#allocation2 + $0x60] sm:$0xff] %vm46_vm0, %v1324_v56 }
 0x56e   :  { %v1259_v57 = vpop.permute.xlu2 %1258 }
 0x56f   :  { %v1301_v58 = vadd.f32 %v1259_v57, %v1221_v37  ;;  %v3185_v37 = vld [vmem:[#allocation2 + $0x1a] sm:$0x1] }
 0x571   :  { %v1317_v59 = vmax.f32 %v1301_v58, 0.0  ;;  %v3208_v58 = vld [vmem:[#allocation2 + $0x3c] sm:$0x1] }
 0x572   :  { %3709 = vst [vmem:[#allocation8_spill] sm:$0xff] %v3208_v58  ;;  %v3225_v56 = vld [vmem:[#allocation2 + $0x61] sm:$0x1]  ;;  %v3231_v28 = vld [vmem:[#allocation2 + $0x62] sm:$0x1] }
 0x573   :  { %1333 = vst.msk [vmem:[#allocation2 + $0x28] sm:$0xff] %vm46_vm0, %v1317_v59  ;;  %v3206_v59 = vld [vmem:[#allocation2 + $0x3b] sm:$0x1]  ;;  %v3233_v25 = vld [vmem:[#allocation2 + $0x63] sm:$0x1] }
 0x574   :  { %3713 = vst [vmem:[#allocation12_spill] sm:$0xff] %v3233_v25 }
 0x576   :  { %v1267_v63 = vpop.permute.xlu2 %1266 }
 0x577   :  { %v1305_v0 = vadd.f32 %v1267_v63, %v1225_v60  ;;  %v3189_v60 = vld [vmem:[#allocation2 + $0x1b] sm:$0x1]  ;;  %v3191_v63 = vld [vmem:[#allocation2 + $0x1c] sm:$0x1] }
 0x579   :  { %v1321_v4 = vmax.f32 %v1305_v0, 0.0 }
 0x57a   :  { %v3235_v51 = vld [vmem:[#allocation2 + $0x28] sm:$0x1]  ;;  %v3239_v50 = vld [vmem:[#allocation2 + $0x2a] sm:$0x1]  ;;  %v3241_v34 = vld [vmem:[#allocation2 + $0x2b] sm:$0x1] }
 0x57b   :  { %1337 = vst.msk [vmem:[#allocation2 + $0x48] sm:$0xff] %vm46_vm0, %v1321_v4  ;;  %v3193_v4 = vld [vmem:[#allocation2 + $0x1d] sm:$0x1]  ;;  %v3244_v23 = vld [vmem:[#allocation2 + $0x2c] sm:$0x1] }
 0x57c   :  { %v3256_v22 = vld [vmem:[#allocation2 + $0x2d] sm:$0x1]  ;;  %v3262_v33 = vld [vmem:[#allocation2 + $0x2f] sm:$0x1] }
 0x57e   :  { %v1279_v24 = vpop.permute.xlu2 %1278 }
 0x57f   :  { %v1311_v30 = vadd.f32 %v1279_v24, %v1231_v20  ;;  %v3199_v20 = vld [vmem:[#allocation2 + $0x38] sm:$0x1]  ;;  %v3201_v24 = vld [vmem:[#allocation2 + $0x39] sm:$0x1] }
 0x581   :  { %v1327_v40 = vmax.f32 %v1311_v30, 0.0  ;;  %v3203_v30 = vld [vmem:[#allocation2 + $0x3a] sm:$0x1] }
 0x582   :  { %v3264_v21 = vld [vmem:[#allocation2 + $0x48] sm:$0x1]  ;;  %v3266_v31 = vld [vmem:[#allocation2 + $0x49] sm:$0x1]  ;;  %v3268_v13 = vld [vmem:[#allocation2 + $0x4a] sm:$0x1] }
 0x583   :  { %1343 = vst.msk [vmem:[#allocation2 + $0x78] sm:$0xff] %vm46_vm0, %v1327_v40  ;;  %v3279_v11 = vld [vmem:[#allocation2 + $0x4b] sm:$0x1]  ;;  %v3281_v25 = vld [vmem:[#allocation2 + $0x4c] sm:$0x1] }
 0x584   :  { %v3283_v54 = vld [vmem:[#allocation2 + $0x4d] sm:$0x1]  ;;  %v3299_v61 = vld [vmem:[#allocation2 + $0x4f] sm:$0x1] }
 0x586   :  { %v1275_v57 = vpop.permute.xlu1 %1274 }
 0x587   :  { %v1309_v0 = vadd.f32 %v1275_v57, %v1229_v41  ;;  %v3221_v57 = vld [vmem:[#allocation2 + $0x3d] sm:$0x1]  ;;  %v3237_v41 = vld [vmem:[#allocation2 + $0x29] sm:$0x1] }
 0x588   :  { %3710 = vst [vmem:[#allocation9_spill] sm:$0xff] %v3221_v57  ;;  %v3286_v57 = vld [vmem:[#allocation2 + $0x4e] sm:$0x1] }
 0x589   :  { %v1325_v40 = vmax.f32 %v1309_v0, 0.0 }
 0x58a   :  { %v3295_v32 = vld [vmem:[#allocation2 + $0x78] sm:$0x1]  ;;  %v3311_v58 = vld [vmem:[#allocation2 + $0x79] sm:$0x1]  ;;  %v3339_v14 = vld [vmem:[#allocation2 + $0x7c] sm:$0x1] }
 0x58b   :  { %1341 = vst.msk [vmem:[#allocation2 + $0x68] sm:$0xff] %vm46_vm0, %v1325_v40  ;;  %v3227_v40 = vld [vmem:[#allocation2 + $0x60] sm:$0x1] }
 0x58e   :  { %v1277_v0 = vpop.permute.xlu0 %1276 }
 0x58f   :  { %v1310_v52 = vadd.f32 %v1277_v0, %v1230_v29  ;;  %v3260_v29 = vld [vmem:[#allocation2 + $0x2e] sm:$0x1] }
 0x591   :  { %v1326_v0 = vmax.f32 %v1310_v52, 0.0  ;;  %v3714_v52 = vrot.slane %v3109_v8, 7  ;;  %v3715_v8 = vmax.f32 %v3086_v42, 0.0 }
 0x593   :  { %1342 = vst.msk [vmem:[#allocation2 + $0x70] sm:$0xff] %vm46_vm0, %v1326_v0  ;;  %v1423_v0 = vsel %vm1372_vm15, %v1422_v2, %v1344_v27  ;;  %v1477_v7 = vsel %vm1372_vm15, %v3714_v52, %v1458_v16  ;;  %v3716_v16 = vrot.slane %v3116_v5, 6  ;;  %v3717_v5 = vrot.slane %v3134_v15, 5  ;;  %v3313_v52 = vld [vmem:[#allocation2 + $0x7a] sm:$0x1] }
 0x595   :  { %v1376_v27 = vsel %vm1375_vm1, %v3716_v16, %v1373_v53 }
 0x596   :  { %v1251_v36 = vpop.permute.xlu0 %1250  ;;  %v1379_v53 = vsel %vm1378_vm2, %v3717_v5, %v1376_v27  ;;  %v3326_v27 = vld [vmem:[#allocation2 + $0x7b] sm:$0x1]  ;;  %v3724_v5 = vrot.slane %v3225_v56, 2 }
 0x597   :  { %v1297_v2 = vadd.f32 %v1251_v36, %v3715_v8  ;;  %v3718_v8 = vrot.slane %v3114_v3, 7  ;;  %v1382_v42 = vsel %vm1381_vm3, %v3719_v1, %v1379_v53  ;;  %v2309_v3 = vld [vmem:[%s3697_s3 + $0x10] sm:$0xff] }
 0x598   :  { %v1385_v1 = vsel %vm1384_vm4, %v3721_v35, %v1382_v42  ;;  %v3357_v35 = vld [vmem:[#allocation2 + $0x69] sm:$0x1] }
 0x599   :  { %v1313_v36 = vmax.f32 %v1297_v2, 0.0  ;;  %v1532_v16 = vsel %vm1372_vm15, %v3718_v8, %v1513_v26  ;;  %v3720_v2 = vrot.slane %v3118_v6, 6  ;;  %v3722_v6 = vrot.slane %v3121_v9, 6  ;;  %v3341_v26 = vld [vmem:[#allocation2 + $0x7d] sm:$0x1] }
 0x59a   :  { %v1360_v62 = vld [vmem:[#allocation2 + $0x71] sm:$0x1]  ;;  %v3723_v8 = vrot.slane %v3123_v10, 6  ;;  %v3726_v9 = vrot.slane %v3139_v18, 5  ;;  %v3727_v10 = vrot.slane %v3141_v19, 5  ;;  %v3729_v18 = vrot.slane %v3158_v39, 4 }
 0x59b   :  { %v1425_v15 = vsel %vm1375_vm1, %v3720_v2, %v1423_v0  ;;  %1329 = vst.msk [vmem:[#allocation2 + $0x8] sm:$0xff] %vm46_vm0, %v1313_v36  ;;  %v1389_v53 = vrot.slane %v1360_v62, 1  ;;  %v1479_v0 = vsel %vm1375_vm1, %v3722_v6, %v1477_v7  ;;  %v1388_v36 = vsel %vm1387_vm5, %v3724_v5, %v1385_v1  ;;  %v3359_v6 = vld [vmem:[#allocation2 + $0x7e] sm:$0x1]  ;;  %v1351_v38 = vld [vmem:[#allocation2 + $0x70] sm:$0x1] }
 0x59c   :  { %v1534_v2 = vsel %vm1375_vm1, %v3723_v8, %v1532_v16  ;;  %v1427_v62 = vsel %vm1378_vm2, %v3725_v55, %v1425_v15  ;;  %v1481_v7 = vsel %vm1378_vm2, %v3726_v9, %v1479_v0  ;;  %v3355_v16 = vld [vmem:[#allocation2 + $0x68] sm:$0x1]  ;;  %v3730_v19 = vrot.slane %v3163_v43, 4  ;;  %v3371_v0 = vld [vmem:[#allocation2 + $0x6a] sm:$0x1] }
 0x59d   :  { %v1536_v42 = vsel %vm1378_vm2, %v3727_v10, %v1534_v2  ;;  %v1391_v56 = vsel %vm1390_vm6, %v1389_v53, %v1388_v36  ;;  %v1429_v15 = vsel %vm1381_vm3, %v3728_v17, %v1427_v62  ;;  %v1483_v5 = vsel %vm1381_vm3, %v3729_v18, %v1481_v7  ;;  %v3373_v8 = vld [vmem:[#allocation2 + $0x6b] sm:$0x1]  ;;  %v3375_v2 = vld [vmem:[#allocation2 + $0x6c] sm:$0x1]  ;;  %v3391_v36 = vld [vmem:[#allocation2 + $0x6d] sm:$0x1] }
 0x59e   :  { %v1538_v1 = vsel %vm1381_vm3, %v3730_v19, %v1536_v42  ;;  %v1271_v55 = vpop.permute.xlu0 %1270  ;;  %2307 = vmatmul.msk.f32.vlgmr.msra.gmra.mxu3 %vm46_vm0, %v1391_v56  ;;  %v3731_v62 = vmax.f32 %v3097_v47, 0.0  ;;  %v1816_v7 = vrot.slane %v3355_v16, 2  ;;  %v1871_v56 = vrot.slane %v3357_v35, 2  ;;  %v3399_v39 = vld [vmem:[#allocation2 + $0x6e] sm:$0x1] }
 0x59f   :  { %1507 = vmatpush.msra.mxu3 %v2309_v3  ;;  %v3732_v47 = vrot.slane %v3165_v44, 3  ;;  %v3733_v10 = vrot.slane %v3167_v45, 3  ;;  %v3734_v53 = vrot.slane %v3227_v40, 2  ;;  %v3735_v19 = vrot.slane %v3231_v28, 2  ;;  %v2311_v44 = vld [vmem:[%s3697_s3 + $0x18] sm:$0xff] }
 0x5a0   :  { %v1307_v9 = vadd.f32 %v1271_v55, %v3731_v62  ;;  %v1434_v55 = vrot.slane %v1351_v38, 1  ;;  %v1465_v62 = vld [vmem:[#allocation2 + $0x72] sm:$0x1]  ;;  %v3737_v40 = vrot.slane %v3173_v48, 7  ;;  %v3741_v48 = vrot.slane %v3237_v41, 6 }
 0x5a1   :  { %v1431_v3 = vsel %vm1384_vm4, %v3732_v47, %v1429_v15  ;;  %v1485_v42 = vsel %vm1384_vm4, %v3733_v10, %v1483_v5  ;;  %v3736_v15 = vrot.slane %v3169_v46, 3  ;;  %v3441_v17 = vld [vmem:[#allocation2 + $0x73] sm:$0x1]  ;;  %v3744_v41 = vrot.slane %v3241_v34, 6 }
 0x5a2   :  { %v1323_v43 = vmax.f32 %v1307_v9, 0.0  ;;  %v1433_v18 = vsel %vm1387_vm5, %v3734_v53, %v1431_v3  ;;  %v1487_v9 = vsel %vm1387_vm5, %v3735_v19, %v1485_v42  ;;  %v1788_v5 = vld [vmem:[#allocation2 + $0x8] sm:$0x1]  ;;  %v1843_v38 = vld [vmem:[#allocation2 + $0x9] sm:$0x1]  ;;  %v3738_v53 = vrot.slane %v3175_v49, 7 }
 0x5a3   :  { %v3413_v45 = vsel %vm1384_vm4, %v3736_v15, %v1538_v1  ;;  %v1898_v10 = vld [vmem:[#allocation2 + $0xa] sm:$0x1]  ;;  %v1807_v28 = vsel %vm1372_vm15, %v3737_v40, %v1788_v5  ;;  %v3739_v19 = vrot.slane %v3185_v37, 7  ;;  %v1953_v47 = vld [vmem:[#allocation2 + $0xb] sm:$0x1]  ;;  %v3740_v15 = vrot.slane %v3235_v51, 6 }
 0x5a4   :  { %1339 = vst.msk [vmem:[#allocation2 + $0x58] sm:$0xff] %vm46_vm0, %v1323_v43  ;;  %v1862_v42 = vsel %vm1372_vm15, %v3738_v53, %v1843_v38  ;;  %v3426_v3 = vld [vmem:[#allocation2 + $0x6f] sm:$0x1]  ;;  %v3742_v49 = vrot.slane %v3239_v50, 6  ;;  %v3743_v37 = vrot.slane %v3189_v60, 7  ;;  %v1435_v1 = vsel %vm1390_vm6, %v1434_v55, %v1433_v18 }
 0x5a5   :  { %v1917_v46 = vsel %vm1372_vm15, %v3739_v19, %v1898_v10  ;;  %v1809_v43 = vsel %vm1375_vm1, %v3740_v15, %v1807_v28  ;;  %v1864_v5 = vsel %vm1375_vm1, %v3741_v48, %v1862_v42  ;;  %v2008_v40 = vld [vmem:[#allocation2 + $0xc] sm:$0x1]  ;;  %v2063_v53 = vld [vmem:[#allocation2 + $0xd] sm:$0x1]  ;;  %v2118_v19 = vld [vmem:[#allocation2 + $0xe] sm:$0x1] }
 0x5a6   :  { %v1919_v38 = vsel %vm1375_vm1, %v3742_v49, %v1917_v46  ;;  %v1972_v10 = vsel %vm1372_vm15, %v3743_v37, %v1953_v47  ;;  %v1488_v51 = vrot.slane %v1465_v62, 1  ;;  %v2146_v50 = vrot.slane %v3399_v39, 2  ;;  %v2173_v42 = vld [vmem:[#allocation2 + $0xf] sm:$0x1]  ;;  %2308 = vmatmul.msk.f32.vlgmr.msrb.gmra.mxu3 %vm46_vm0, %v1435_v1  ;;  %v3754_v37 = vld [vmem:[#allocation7_spill] sm:$0xff] }
 0x5a7   :  { %v1974_v28 = vsel %vm1375_vm1, %v3744_v41, %v1972_v10  ;;  %v3745_v60 = vrot.slane %v3199_v20, 5  ;;  %v3746_v47 = vrot.slane %v3201_v24, 5  ;;  %v3747_v55 = vrot.slane %v3203_v30, 5  ;;  %1562 = vmatpush.msrb.mxu3 %v2311_v44 }
 0x5a8   :  { %v2201_v34 = vrot.slane %v3426_v3, 2  ;;  %v3748_v15 = vrot.slane %v3206_v59, 5  ;;  %v3749_v1 = vrot.slane %v3191_v63, 7  ;;  %v1543_v49 = vrot.slane %v3441_v17, 1  ;;  %v3787_v3 = vld [vmem:[#allocation6_spill] sm:$0xff] }
 0x5a9   :  { %v1811_v46 = vsel %vm1378_vm2, %v3745_v60, %v1809_v43  ;;  %v1866_v18 = vsel %vm1378_vm2, %v3746_v47, %v1864_v5  ;;  %v1921_v62 = vsel %vm1378_vm2, %v3747_v55, %v1919_v38  ;;  %v3750_v43 = vrot.slane %v3193_v4, 7 }
 0x5aa   :  { %v1976_v48 = vsel %vm1378_vm2, %v3748_v15, %v1974_v28  ;;  %v2027_v20 = vsel %vm1372_vm15, %v3749_v1, %v2008_v40  ;;  %v3751_v5 = vrot.slane %v3195_v12, 7  ;;  %v3752_v44 = vrot.slane %v3244_v23, 6 }
 0x5ab   :  { %v2082_v24 = vsel %vm1372_vm15, %v3750_v43, %v2063_v53  ;;  %v3753_v38 = vrot.slane %v3256_v22, 6  ;;  %v3755_v10 = vrot.slane %v3754_v37, 7  ;;  %v1489_v40 = vsel %vm1390_vm6, %v1488_v51, %v1487_v9  ;;  %v3756_v53 = vld [vmem:[#allocation8_spill] sm:$0xff]  ;;  %v3769_v37 = vld [vmem:[#allocation11_spill] sm:$0xff] }
 0x5ac   :  { %v2137_v30 = vsel %vm1372_vm15, %v3751_v5, %v2118_v19  ;;  %v2029_v59 = vsel %vm1375_vm1, %v3752_v44, %v2027_v20  ;;  %v3757_v12 = vrot.slane %v3756_v53, 5  ;;  %v3758_v41 = vrot.slane %v3260_v29, 6  ;;  %v1793_v60 = vld [vmem:[#allocation2 + $0x58] sm:$0x1]  ;;  %v1903_v15 = vld [vmem:[#allocation2 + $0x5a] sm:$0x1] }
 0x5ad   :  { %v2084_v63 = vsel %vm1375_vm1, %v3753_v38, %v2082_v24  ;;  %v2192_v4 = vsel %vm1372_vm15, %v3755_v10, %v2173_v42  ;;  %v3759_v28 = vrot.slane %v3262_v33, 6  ;;  %v3760_v47 = vrot.slane %v3264_v21, 4  ;;  %v1848_v42 = vld [vmem:[#allocation2 + $0x59] sm:$0x1]  ;;  %v1958_v21 = vld [vmem:[#allocation2 + $0x5b] sm:$0x1] }
 0x5ae   :  { %v2031_v19 = vsel %vm1378_vm2, %v3757_v12, %v2029_v59  ;;  %v2139_v23 = vsel %vm1375_vm1, %v3758_v41, %v2137_v30  ;;  %v3761_v9 = vrot.slane %v3266_v31, 4  ;;  %v3762_v1 = vrot.slane %v3268_v13, 4  ;;  %v3764_v30 = vld [vmem:[#allocation9_spill] sm:$0xff]  ;;  %v2013_v13 = vld [vmem:[#allocation2 + $0x5c] sm:$0x1]  ;;  %v3767_v59 = vld [vmem:[#allocation10_spill] sm:$0xff]  ;;  %2310 = vmatmul.msk.f32.vlgmr.msra.gmra.mxu3 %vm46_vm0, %v1489_v40 }
 0x5af   :  { %v2194_v22 = vsel %vm1375_vm1, %v3759_v28, %v2192_v4  ;;  %v1813_v55 = vsel %vm1381_vm3, %v3760_v47, %v1811_v46  ;;  %v3763_v20 = vrot.slane %v3279_v11, 4  ;;  %v1814_v43 = vrot.slane %v1793_v60, 3  ;;  %v2313_v31 = vld [vmem:[%s3697_s3 + $0x20] sm:$0xff]  ;;  %v2068_v28 = vld [vmem:[#allocation2 + $0x5d] sm:$0x1] }
 0x5b0   :  { %v1868_v51 = vsel %vm1381_vm3, %v3761_v9, %v1866_v18  ;;  %v1923_v29 = vsel %vm1381_vm3, %v3762_v1, %v1921_v62  ;;  %v1869_v24 = vrot.slane %v1848_v42, 3  ;;  %v1924_v5 = vrot.slane %v1903_v15, 3  ;;  %v2123_v60 = vld [vmem:[#allocation2 + $0x5e] sm:$0x1]  ;;  %1617 = vmatpush.msra.mxu3 %v2313_v31 }
 0x5b1   :  { %v1978_v33 = vsel %vm1381_vm3, %v3763_v20, %v1976_v48  ;;  %v3765_v46 = vrot.slane %v3764_v30, 5  ;;  %v1979_v18 = vrot.slane %v1958_v21, 3  ;;  %v3766_v62 = vrot.slane %v3281_v25, 4  ;;  %v1571_v21 = vld [vmem:[#allocation2 + $0x34] sm:$0x1] }
 0x5b2   :  { %v3768_v48 = vrot.slane %v3767_v59, 5  ;;  %v3770_v10 = vrot.slane %v3769_v37, 5  ;;  %v1870_v53 = vsel %vm1384_vm4, %v1869_v24, %v1868_v51  ;;  %v1925_v12 = vsel %vm1384_vm4, %v1924_v5, %v1923_v29  ;;  %v2180_v29 = vld [vmem:[#allocation2 + $0x7f] sm:$0x1]  ;;  %v1569_v5 = vld [vmem:[#allocation2 + $0x14] sm:$0x1] }
 0x5b3   :  { %v2086_v44 = vsel %vm1378_vm2, %v3765_v46, %v2084_v63  ;;  %v2033_v11 = vsel %vm1381_vm3, %v3766_v62, %v2031_v19  ;;  %v1815_v63 = vsel %vm1384_vm4, %v1814_v43, %v1813_v55  ;;  %v2034_v41 = vrot.slane %v2013_v13, 3  ;;  %v2178_v55 = vld [vmem:[#allocation2 + $0x5f] sm:$0x1]  ;;  %v1573_v37 = vld [vmem:[#allocation2 + $0x54] sm:$0x1] }
 0x5b4   :  { %v2141_v38 = vsel %vm1378_vm2, %v3768_v48, %v2139_v23  ;;  %v2196_v4 = vsel %vm1378_vm2, %v3770_v10, %v2194_v22  ;;  %v1817_v25 = vsel %vm1387_vm5, %v1816_v7, %v1815_v63  ;;  %v1872_v19 = vsel %vm1387_vm5, %v1871_v56, %v1870_v53  ;;  %v3783_v59 = vld [vmem:[#allocation12_spill] sm:$0xff]  ;;  %v1574_v53 = vld [vmem:[#allocation2 + $0x64] sm:$0x1] }
 0x5b5   :  { %v3771_v23 = vrot.slane %v3371_v0, 2  ;;  %v1980_v47 = vsel %vm1384_vm4, %v1979_v18, %v1978_v33  ;;  %v3772_v42 = vrot.slane %v3295_v32, 1  ;;  %v3773_v16 = vrot.slane %v3311_v58, 1  ;;  %v1572_v18 = vld [vmem:[#allocation2 + $0x44] sm:$0x1] }
 0x5b6   :  { %v3774_v35 = vrot.slane %v3313_v52, 1  ;;  %v3775_v56 = vrot.slane %v3373_v8, 2  ;;  %v3776_v51 = vrot.slane %v3326_v27, 1  ;;  %v2035_v15 = vsel %vm1384_vm4, %v2034_v41, %v2033_v11 }
 0x5b7   :  { %v1927_v22 = vsel %vm1387_vm5, %v3771_v23, %v1925_v12  ;;  %v3534_v40 = vsel %vm1390_vm6, %v3772_v42, %v1817_v25  ;;  %v3539_v7 = vsel %vm1390_vm6, %v3773_v16, %v1872_v19  ;;  %v2089_v58 = vrot.slane %v2068_v28, 3  ;;  %v1626_v42 = vld [vmem:[#allocation2 + $0x35] sm:$0x1] }
 0x5b8   :  { %v3544_v0 = vsel %vm1390_vm6, %v3774_v35, %v1927_v22  ;;  %v1982_v9 = vsel %vm1387_vm5, %v3775_v56, %v1980_v47  ;;  %v2144_v1 = vrot.slane %v2123_v60, 3  ;;  %v3777_v20 = vrot.slane %v3375_v2, 2  ;;  %v1625_v22 = vld [vmem:[#allocation2 + $0x25] sm:$0x1] }
 0x5b9   :  { %v3552_v32 = vsel %vm1390_vm6, %v3776_v51, %v1982_v9  ;;  %v3778_v33 = vrot.slane %v3283_v54, 4  ;;  %v3779_v43 = vrot.slane %v3286_v57, 4  ;;  %v2199_v24 = vrot.slane %v2178_v55, 3  ;;  %v1624_v55 = vld [vmem:[#allocation2 + $0x15] sm:$0x1] }
 0x5ba   :  { %v2037_v52 = vsel %vm1387_vm5, %v3777_v20, %v2035_v15  ;;  %v3780_v30 = vrot.slane %v3339_v14, 1  ;;  %v3781_v54 = vrot.slane %v3299_v61, 4  ;;  %v3782_v57 = vrot.slane %v3391_v36, 2  ;;  %v1568_v61 = vld [vmem:[#allocation2 + $0x4] sm:$0x1]  ;;  %v2315_v36 = vld [vmem:[%s3697_s3 + $0x28] sm:$0xff] }
 0x5bb   :  { %v2088_v8 = vsel %vm1381_vm3, %v3778_v33, %v2086_v44  ;;  %v2143_v27 = vsel %vm1381_vm3, %v3779_v43, %v2141_v38  ;;  %v2203_v11 = vrot.slane %v2180_v29, 1  ;;  %v3784_v48 = vrot.slane %v3783_v59, 2  ;;  %v1627_v35 = vld [vmem:[#allocation2 + $0x45] sm:$0x1]  ;;  %v1628_v51 = vld [vmem:[#allocation2 + $0x55] sm:$0x1] }
 0x5bc   :  { %v3567_v46 = vsel %vm1390_vm6, %v3780_v30, %v2037_v52  ;;  %v2090_v2 = vsel %vm1384_vm4, %v2089_v58, %v2088_v8  ;;  %v2145_v31 = vsel %vm1384_vm4, %v2144_v1, %v2143_v27  ;;  %v2198_v44 = vsel %vm1381_vm3, %v3781_v54, %v2196_v4  ;;  %v1623_v9 = vld [vmem:[#allocation2 + $0x5] sm:$0x1]  ;;  %v2317_v58 = vld [vmem:[%s3697_s3 + $0x30] sm:$0xff]  ;;  %v2319_v59 = vld [vmem:[%s3697_s3 + $0x38] sm:$0xff] }
 0x5bd   :  { %v2092_v13 = vsel %vm1387_vm5, %v3782_v57, %v2090_v2  ;;  %v2147_v14 = vsel %vm1387_vm5, %v2146_v50, %v2145_v31  ;;  %v2200_v62 = vsel %vm1384_vm4, %v2199_v24, %v2198_v44  ;;  %v1542_v38 = vsel %vm1387_vm5, %v3784_v48, %v3413_v45  ;;  %v1629_v29 = vld [vmem:[#allocation2 + $0x65] sm:$0x1]  ;;  %v1630_v33 = vld [vmem:[#allocation2 + $0x75] sm:$0x1]  ;;  %v1680_v2 = vld [vmem:[#allocation2 + $0x26] sm:$0x1] }
 0x5be   :  { %v3785_v10 = vrot.slane %v3341_v26, 1  ;;  %v3786_v50 = vrot.slane %v3359_v6, 1  ;;  %v2202_v45 = vsel %vm1387_vm5, %v2201_v34, %v2200_v62  ;;  %v1544_v63 = vsel %vm1390_vm6, %v1543_v49, %v1542_v38  ;;  %v1575_v6 = vld [vmem:[#allocation2 + $0x74] sm:$0x1]  ;;  %v1679_v54 = vld [vmem:[#allocation2 + $0x16] sm:$0x1] }
 0x5bf   :  { %v1586_v12 = vrot.slane %v1569_v5, 7  ;;  %v1590_v41 = vrot.slane %v1571_v21, 5  ;;  %v3605_v26 = vsel %vm1390_vm6, %v2203_v11, %v2202_v45  ;;  %2312 = vmatmul.msk.f32.vlgmr.msrb.gmra.mxu3 %vm46_vm0, %v1544_v63  ;;  %v1592_v28 = vrot.slane %v1572_v18, 4  ;;  %v1681_v44 = vld [vmem:[#allocation2 + $0x36] sm:$0x1] }
 0x5c0   :  { %v3591_v39 = vsel %vm1390_vm6, %v3785_v10, %v2092_v13  ;;  %v3596_v4 = vsel %vm1390_vm6, %v3786_v50, %v2147_v14  ;;  %v1594_v25 = vrot.slane %v1573_v37, 3  ;;  %1672 = vmatpush.msrb.mxu3 %v2315_v36  ;;  %v3788_v34 = vrot.slane %v3787_v3, 6  ;;  %v1682_v57 = vld [vmem:[#allocation2 + $0x46] sm:$0x1]  ;;  %v1683_v62 = vld [vmem:[#allocation2 + $0x56] sm:$0x1] }
 0x5c1   :  { %v1587_v60 = vsel %vm1372_vm15, %v1586_v12, %v1568_v61  ;;  %v1596_v19 = vrot.slane %v1574_v53, 2  ;;  %v1598_v23 = vrot.slane %v1575_v6, 1  ;;  %v1643_v15 = vrot.slane %v1625_v22, 6  ;;  %v1678_v14 = vld [vmem:[#allocation2 + $0x6] sm:$0x1] }
 0x5c2   :  { %v1589_v17 = vsel %vm1375_vm1, %v3788_v34, %v1587_v60  ;;  %v1641_v20 = vrot.slane %v1624_v55, 7  ;;  %v1645_v52 = vrot.slane %v1626_v42, 5  ;;  %v1647_v8 = vrot.slane %v1627_v35, 4  ;;  %v1684_v38 = vld [vmem:[#allocation2 + $0x66] sm:$0x1] }
 0x5c3   :  { %v1591_v49 = vsel %vm1378_vm2, %v1590_v41, %v1589_v17  ;;  %v1649_v27 = vrot.slane %v1628_v51, 3  ;;  %v1651_v5 = vrot.slane %v1629_v29, 2  ;;  %v1653_v30 = vrot.slane %v1630_v33, 1  ;;  %v1685_v36 = vld [vmem:[#allocation2 + $0x76] sm:$0x1]  ;;  %v2321_v22 = vld [vmem:[%s3697_s3 + $0x40] sm:$0xff] }
 0x5c4   :  { %v1593_v47 = vsel %vm1381_vm3, %v1592_v28, %v1591_v49  ;;  %v1642_v43 = vsel %vm1372_vm15, %v1641_v20, %v1623_v9  ;;  %v1698_v11 = vrot.slane %v1680_v2, 6  ;;  %v1696_v61 = vrot.slane %v1679_v54, 7  ;;  %v1735_v6 = vld [vmem:[#allocation2 + $0x27] sm:$0x1]  ;;  %v1734_v60 = vld [vmem:[#allocation2 + $0x17] sm:$0x1] }
 0x5c5   :  { %v1595_v16 = vsel %vm1384_vm4, %v1594_v25, %v1593_v47  ;;  %v1644_v24 = vsel %vm1375_vm1, %v1643_v15, %v1642_v43  ;;  %v1700_v37 = vrot.slane %v1681_v44, 5  ;;  %v1702_v10 = vrot.slane %v1682_v57, 4  ;;  %v1736_v25 = vld [vmem:[#allocation2 + $0x37] sm:$0x1]  ;;  %v1737_v34 = vld [vmem:[#allocation2 + $0x47] sm:$0x1] }
 0x5c6   :  { %v1597_v56 = vsel %vm1387_vm5, %v1596_v19, %v1595_v16  ;;  %v1646_v21 = vsel %vm1378_vm2, %v1645_v52, %v1644_v24  ;;  %v1697_v50 = vsel %vm1372_vm15, %v1696_v61, %v1678_v14  ;;  %v1704_v45 = vrot.slane %v1683_v62, 3  ;;  %v1733_v19 = vld [vmem:[#allocation2 + $0x7] sm:$0x1]  ;;  %v1738_v49 = vld [vmem:[#allocation2 + $0x57] sm:$0x1]  ;;  %v2327_v24 = vld [vmem:[%s3697_s3 + $0x58] sm:$0xff] }
 0x5c7   :  { %v1599_v1 = vsel %vm1390_vm6, %v1598_v23, %v1597_v56  ;;  %v1648_v31 = vsel %vm1381_vm3, %v1647_v8, %v1646_v21  ;;  %v1699_v63 = vsel %vm1375_vm1, %v1698_v11, %v1697_v50  ;;  %v1706_v53 = vrot.slane %v1684_v38, 2  ;;  %v1739_v55 = vld [vmem:[#allocation2 + $0x67] sm:$0x1]  ;;  %v1740_v35 = vld [vmem:[#allocation2 + $0x77] sm:$0x1]  ;;  %v2323_v8 = vld [vmem:[%s3697_s3 + $0x48] sm:$0xff] }
 0x5c8   :  { %2314 = vmatmul.msk.f32.vlgmr.msra.gmra.mxu3 %vm46_vm0, %v1599_v1  ;;  %v1650_v18 = vsel %vm1384_vm4, %v1649_v27, %v1648_v31  ;;  %v1701_v12 = vsel %vm1378_vm2, %v1700_v37, %v1699_v63  ;;  %v1708_v41 = vrot.slane %v1685_v36, 1  ;;  %v1753_v23 = vrot.slane %v1735_v6, 6  ;;  %v2325_v27 = vld [vmem:[%s3697_s3 + $0x50] sm:$0xff] }
 0x5c9   :  { %1727 = vmatpush.msra.mxu3 %v2317_v58  ;;  %v1652_v13 = vsel %vm1387_vm5, %v1651_v5, %v1650_v18  ;;  %v1703_v28 = vsel %vm1381_vm3, %v1702_v10, %v1701_v12  ;;  %v1751_v42 = vrot.slane %v1734_v60, 7  ;;  %v1755_v16 = vrot.slane %v1736_v25, 5  ;;  %v2329_v5 = vld [vmem:[%s3697_s3 + $0x60] sm:$0xff] }
 0x5ca   :  { %v1654_v48 = vsel %vm1390_vm6, %v1653_v30, %v1652_v13  ;;  %v1705_v3 = vsel %vm1384_vm4, %v1704_v45, %v1703_v28  ;;  %v1757_v56 = vrot.slane %v1737_v34, 4  ;;  %v1759_v51 = vrot.slane %v1738_v49, 3 }
 0x5cb   :  { %v1707_v17 = vsel %vm1387_vm5, %v1706_v53, %v1705_v3  ;;  %v1752_v9 = vsel %vm1372_vm15, %v1751_v42, %v1733_v19  ;;  %v1761_v58 = vrot.slane %v1739_v55, 2  ;;  %v1763_v29 = vrot.slane %v1740_v35, 1 }
 0x5cc   :  { %v1709_v47 = vsel %vm1390_vm6, %v1708_v41, %v1707_v17  ;;  %v1754_v15 = vsel %vm1375_vm1, %v1753_v23, %v1752_v9  ;;  %v2345_v41 = vld [vmem:[%s3698_s4] ss:$0 sm:$0xff] }
 0x5cd   :  { %v1756_v1 = vsel %vm1378_vm2, %v1755_v16, %v1754_v15 }
 0x5ce   :  { %v1758_v20 = vsel %vm1381_vm3, %v1757_v56, %v1756_v1 }
 0x5cf   :  { %v1760_v52 = vsel %vm1384_vm4, %v1759_v51, %v1758_v20 }
 0x5d0   :  { %2316 = vmatmul.msk.f32.vlgmr.msrb.gmra.mxu3 %vm46_vm0, %v1654_v48  ;;  %v1762_v33 = vsel %vm1387_vm5, %v1761_v58, %v1760_v52 }
 0x5d1   :  { %1782 = vmatpush.msrb.mxu3 %v2319_v59  ;;  %v1764_v43 = vsel %vm1390_vm6, %v1763_v29, %v1762_v33 }
 0x5d8   :  { %2318 = vmatmul.msk.f32.vlgmr.msra.gmra.mxu3 %vm46_vm0, %v1709_v47 }
 0x5d9   :  { %1837 = vmatpush.msra.mxu3 %v2321_v22 }
 0x5e0   :  { %2320 = vmatmul.msk.f32.vlgmr.msrb.gmra.mxu3 %vm46_vm0, %v1764_v43 }
 0x5e1   :  { %1892 = vmatpush.msrb.mxu3 %v2323_v8 }
 0x5e8   :  { %2322 = vmatmul.msk.f32.vlgmr.msra.gmra.mxu3 %vm46_vm0, %v3534_v40  ;;  %v2331_v40 = vld [vmem:[%s3697_s3 + $0x68] sm:$0xff] }
 0x5e9   :  { %1947 = vmatpush.msra.mxu3 %v2325_v27 }
 0x5f0   :  { %2324 = vmatmul.msk.f32.vlgmr.msrb.gmra.mxu3 %vm46_vm0, %v3539_v7  ;;  %v2333_v7 = vld [vmem:[%s3697_s3 + $0x70] sm:$0xff] }
 0x5f1   :  { %2002 = vmatpush.msrb.mxu3 %v2327_v24 }
 0x5f8   :  { %2326 = vmatmul.msk.f32.vlgmr.msra.gmra.mxu3 %vm46_vm0, %v3544_v0  ;;  %v2335_v0 = vld [vmem:[%s3697_s3 + $0x78] sm:$0xff] }
 0x5f9   :  { %2057 = vmatpush.msra.mxu3 %v2329_v5 }
 0x600   :  { %2328 = vmatmul.msk.f32.vlgmr.msrb.gmra.mxu3 %vm46_vm0, %v3552_v32 }
 0x601   :  { %2112 = vmatpush.msrb.mxu3 %v2331_v40 }
 0x608   :  { %2330 = vmatmul.msk.f32.vlgmr.msra.gmra.mxu3 %vm46_vm0, %v3567_v46 }
 0x609   :  { %2167 = vmatpush.msra.mxu3 %v2333_v7 }
 0x610   :  { %2332 = vmatmul.msk.f32.vlgmr.msrb.gmra.mxu3 %vm46_vm0, %v3591_v39 }
 0x611   :  { %2222 = vmatpush.msrb.mxu3 %v2335_v0 }
 0x618   :  { %2334 = vmatmul.msk.f32.vlgmr.msra.gmra.mxu3 %vm46_vm0, %v3596_v4 }
 0x620   :  { %2336 = vmatmul.msk.f32.vlgmr.msrb.gmra.mxu3 %vm46_vm0, %v3605_v26 }
 0x621   :  { %v1411_v32 = vpop.f32.mrf.mxu3 }
 0x629   :  { %v1455_v21 = vpop.f32.mrf.mxu3 }
 0x62a   :  { %v1456_v30 = vadd.f32 %v1455_v21, %v1411_v32 }
 0x631   :  { %v1509_v2 = vpop.f32.mrf.mxu3 }
 0x632   :  { %v1512_v46 = vadd.f32 %v1509_v2, %v1456_v30 }
 0x642   :  { %v1564_v31 = vpop.f32.mrf.mxu3 }
 0x643   :  { %v1567_v54 = vadd.f32 %v1564_v31, %v1512_v46 }
 0x64b   :  { %v1619_v44 = vpop.f32.mrf.mxu3 }
 0x64c   :  { %v1622_v18 = vadd.f32 %v1619_v44, %v1567_v54 }
 0x653   :  { %v1674_v57 = vpop.f32.mrf.mxu3 }
 0x654   :  { %v1677_v48 = vadd.f32 %v1674_v57, %v1622_v18 }
 0x65b   :  { %v1729_v13 = vpop.f32.mrf.mxu3 }
 0x65c   :  { %v1732_v38 = vadd.f32 %v1729_v13, %v1677_v48 }
 0x663   :  { %v1784_v14 = vpop.f32.mrf.mxu3 }
 0x664   :  { %v1787_v61 = vadd.f32 %v1784_v14, %v1732_v38 }
 0x66b   :  { %v1839_v39 = vpop.f32.mrf.mxu3 }
 0x66c   :  { %v1842_v37 = vadd.f32 %v1839_v39, %v1787_v61 }
 0x673   :  { %v1894_v62 = vpop.f32.mrf.mxu3 }
 0x674   :  { %v1897_v36 = vadd.f32 %v1894_v62, %v1842_v37 }
 0x67b   :  { %v1949_v11 = vpop.f32.mrf.mxu3 }
 0x67c   :  { %v1952_v10 = vadd.f32 %v1949_v11, %v1897_v36 }
 0x683   :  { %v2004_v59 = vpop.f32.mrf.mxu3 }
 0x684   :  { %v2007_v45 = vadd.f32 %v2004_v59, %v1952_v10 }
 0x68b   :  { %v2059_v4 = vpop.f32.mrf.mxu3 }
 0x68c   :  { %v2062_v63 = vadd.f32 %v2059_v4, %v2007_v45 }
 0x693   :  { %v2114_v26 = vpop.f32.mrf.mxu3 }
 0x694   :  { %v2117_v53 = vadd.f32 %v2114_v26, %v2062_v63 }
 0x69b   :  { %v2169_v50 = vpop.f32.mrf.mxu3 }
 0x69c   :  { %v2172_v12 = vadd.f32 %v2169_v50, %v2117_v53 }
 0x6a3   :  { %v2224_v6 = vpop.f32.mrf.mxu3 }
 0x6a4   :  { %v2227_v28 = vadd.f32 %v2224_v6, %v2172_v12 }
 0x6a6   :  { %v2232_v60 = vadd.f32 %v2345_v41, %v2227_v28 }
 0x6a8   :  { %2233 = vst [vmem:[#allocation3] sm:$0xff] %v2232_v60 }
 0x6a9   :  { %2244 = dma.vmem_to_hbm [thread:$0]  %s2240_s7, 128, %s2242_s0, [#allocation4]  }
 0x6aa   :  { %2370 = dma.done.wait [#allocation4], 128  }
 0x6ab   :  { %2371 = vsyncadd [#allocation4], 4294967168 }
 0x6ac   :  { %2249 = vsyncpa [#allocation4], 1 }

</bundles_post_ra>
